<compile_context>
chip_gen: v5e
topology: v5e:2x2
jax: 0.10.0
libtpu: 0.0.40
codegen_flags: <defaults>
</compile_context>

<pallas_src>
import functools
import math

import jax
import jax.numpy as jnp
from jax.experimental import pallas as pl
from jax.experimental.pallas import tpu as pltpu


def differential_attn_lambda_init(depth: int) -> float:
    return 0.8 - 0.6 * math.exp(-0.3 * depth)


# ----------------------------------------------------------------------------
# Fused Pallas kernel: grid = (batch, kv_tile).  All heads processed per step.
# ----------------------------------------------------------------------------
def _diff_attn_kernel(lam_ref, x_ref, wqkv_ref, wproj_ref, gamma_ref, o_ref,
                      q1_scr, q2_scr, k1_scr, k2_scr, v_scr,
                      m1_scr, l1_scr, acc1_scr, m2_scr, l2_scr, acc2_scr,
                      *, num_heads, head_dim, kv_tile, eps, compute_dtype):
    H = num_heads
    D = head_dim
    Dqk = D // 2
    HQ = H * Dqk
    _, N, M = x_ref.shape
    kv_idx = pl.program_id(1)

    # --- first KV step for this batch element: fused QKV projection (single
    #     MXU call, f32 accumulation) + one-time per-head unpack into
    #     head-major scratch + accumulator init.
    @pl.when(kv_idx == 0)
    def _():
        qkv = jnp.dot(x_ref[0], wqkv_ref[...],
                      preferred_element_type=jnp.float32)     # (N, 3*H*D) f32
        qkv = qkv.astype(compute_dtype)
        # One-time unpack (per batch element) into (H, N, d) scratch so the
        # hot KV loop below is purely head-batched matmuls with no relayouts.
        # Columns are grouped [Q1 | Q2 | K1 | K2 | V], head-major per group;
        # the 1/sqrt(Dqk) scale is already folded into the Q weight columns.
        for h in range(H):                                    # static, small
            q1_scr[h] = qkv[:, h * Dqk:(h + 1) * Dqk]
            q2_scr[h] = qkv[:, HQ + h * Dqk:HQ + (h + 1) * Dqk]
            k1_scr[h] = qkv[:, 2 * HQ + h * Dqk:2 * HQ + (h + 1) * Dqk]
            k2_scr[h] = qkv[:, 3 * HQ + h * Dqk:3 * HQ + (h + 1) * Dqk]
            v_scr[h] = qkv[:, 4 * HQ + h * D:4 * HQ + (h + 1) * D]
        m1_scr[...] = jnp.full_like(m1_scr, -jnp.inf)
        m2_scr[...] = jnp.full_like(m2_scr, -jnp.inf)
        l1_scr[...] = jnp.zeros_like(l1_scr)
        l2_scr[...] = jnp.zeros_like(l2_scr)
        acc1_scr[...] = jnp.zeros_like(acc1_scr)
        acc2_scr[...] = jnp.zeros_like(acc2_scr)

    # --- online dual-softmax update for this KV tile.
    row0 = pl.multiple_of(kv_idx * kv_tile, kv_tile)
    q1 = q1_scr[...]                                          # (H, N, Dqk)
    q2 = q2_scr[...]
    k1 = k1_scr[:, pl.ds(row0, kv_tile), :]                   # (H, T, Dqk)
    k2 = k2_scr[:, pl.ds(row0, kv_tile), :]
    v = v_scr[:, pl.ds(row0, kv_tile), :]                     # (H, T, D)

    # Head-batched NT score matmuls (no transposes of K).
    s1 = jnp.einsum('hqd,hkd->hqk', q1, k1,
                    preferred_element_type=jnp.float32)       # (H, N, T) f32
    s2 = jnp.einsum('hqd,hkd->hqk', q2, k2,
                    preferred_element_type=jnp.float32)

    def online_update(s, m_scr, l_scr, acc_scr):
        m_prev = m_scr[...]
        m_new = jnp.maximum(m_prev, s.max(axis=-1, keepdims=True))
        alpha = jnp.exp(m_prev - m_new)
        p = jnp.exp(s - m_new)
        l_scr[...] = alpha * l_scr[...] + p.sum(axis=-1, keepdims=True)
        # Accumulate the UNNORMALIZED PV product; normalization happens once,
        # after all KV tiles (post-PV normalization).
        acc_scr[...] = alpha * acc_scr[...] + jnp.einsum(
            'hqk,hkd->hqd', p.astype(compute_dtype), v,
            preferred_element_type=jnp.float32)
        m_scr[...] = m_new

    online_update(s1, m1_scr, l1_scr, acc1_scr)
    online_update(s2, m2_scr, l2_scr, acc2_scr)

    # --- last KV step: post-PV normalization, differential combine, per-head
    #     RMSNorm, output projection, single dense store of the final tile.
    @pl.when(kv_idx == pl.num_programs(1) - 1)
    def _():
        lam = lam_ref[0, 0]
        inv1 = 1.0 / l1_scr[...]          # exact; only (H, N, 1) columns
        inv2 = 1.0 / l2_scr[...]
        out_h = acc1_scr[...] * inv1 - lam * (acc2_scr[...] * inv2)  # (H,N,D) f32

        # Per-head RMSNorm; gamma already carries the (1 - lambda_init) factor.
        ms = jnp.mean(out_h * out_h, axis=-1, keepdims=True)
        out_h = out_h * jax.lax.rsqrt(ms + eps) * gamma_ref[...]

        # Output projection accumulated over heads (static small loop); avoids
        # an (H, N, D) -> (N, H*D) relayout and keeps each MXU call lane-dense
        # in the modelDim output.
        o = jnp.zeros((N, M), dtype=jnp.float32)
        for h in range(H):
            o = o + jnp.dot(out_h[h].astype(compute_dtype), wproj_ref[h],
                            preferred_element_type=jnp.float32)
        o_ref[0] = o.astype(o_ref.dtype)


# ----------------------------------------------------------------------------
# Forward wrapper.
# ----------------------------------------------------------------------------
def _pick_kv_tile(n, target=512):
    if n <= target:
        return n
    t = target
    while t > 0 and n % t != 0:
        t -= 8
    return t if t > 0 else n


def _vmem_limit_bytes(n, m, h, d, kv_tile, compute_itemsize):
    hd = h * d
    est = 0
    est += 2 * n * m * (compute_itemsize + 4)          # x block (dbl-buf) + out block
    est += (m * 3 * hd + hd * m) * compute_itemsize    # resident weights
    est += 3 * n * hd * compute_itemsize               # q/k/v head-major scratch
    est += (4 * h * n + 2 * h * n * d) * 4             # m/l + accumulators (f32)
    est += 4 * h * n * kv_tile * 4                     # live s/p score tiles (f32)
    est += 3 * n * 3 * hd * 4                          # transient qkv value at kv==0
    est += 4 * h * n * d * 4                           # misc (H,N,D) temporaries
    # 2x safety margin, clamped to a budget portable across v5e/v6e (128 MiB
    # physical) and v7x (64 MiB physical).
    return int(min(max(2 * est, 32 * 2 ** 20), 48 * 2 ** 20))


def differential_attention_forward(x, params, *, num_heads, head_dim,
                                   lambda_init, compute_dtype=jnp.float32,
                                   eps=1e-6, kv_tile=None):
    """x: (B, N, modelDim) float32."""
    B, N, M = x.shape
    H = num_heads
    D = head_dim
    Dqk = D // 2
    HQ = H * Dqk
    HD = H * D
    scale = Dqk ** (-0.5)

    tkv = _pick_kv_tile(N) if kv_tile is None else kv_tile
    assert N % tkv == 0, "kv tile must divide sequence length"
    n_kv = N // tkv

    # lambda_full scalar (SMEM input).
    lam1 = jnp.exp(jnp.sum(params["lambda_q1"] * params["lambda_k1"]))
    lam2 = jnp.exp(jnp.sum(params["lambda_q2"] * params["lambda_k2"]))
    lam_full = (lam1 - lam2 + lambda_init).reshape(1, 1).astype(jnp.float32)

    # Offline weight prep (one-time in a real model):
    #  * transpose so the kernel contracts with no in-kernel weight transposes,
    #  * regroup QKV columns as [Q1 | Q2 | K1 | K2 | V] (head-major per group),
    #  * fold the 1/sqrt(Dqk) score scale into the Q columns,
    #  * optionally cast to bf16 so MXU operands and DMA bytes are halved.
    w_qkv_t = params["w_qkv"].T                          # (M, 3*HD), cols [q|k|v]
    q_w = w_qkv_t[:, :HD].reshape(M, H, D)
    k_w = w_qkv_t[:, HD:2 * HD].reshape(M, H, D)
    v_w = w_qkv_t[:, 2 * HD:]                            # (M, HD), head-major
    w_qkv_g = jnp.concatenate([
        (q_w[:, :, :Dqk] * scale).reshape(M, HQ),
        (q_w[:, :, Dqk:] * scale).reshape(M, HQ),
        k_w[:, :, :Dqk].reshape(M, HQ),
        k_w[:, :, Dqk:].reshape(M, HQ),
        v_w,
    ], axis=1).astype(compute_dtype)                     # (M, 3*HD)

    w_proj_3d = params["w_proj"].T.reshape(H, D, M).astype(compute_dtype)

    # Fold (1 - lambda_init) into the RMSNorm gamma (f32, VPU math stays f32).
    gamma = (params["rms_weight"] * (1.0 - lambda_init)).reshape(1, 1, D)
    gamma = gamma.astype(jnp.float32)

    x_c = x.astype(compute_dtype)

    kernel = functools.partial(
        _diff_attn_kernel, num_heads=H, head_dim=D, kv_tile=tkv,
        eps=eps, compute_dtype=compute_dtype)

    vmem_limit = _vmem_limit_bytes(N, M, H, D, tkv,
                                   jnp.dtype(compute_dtype).itemsize)

    return pl.pallas_call(
        kernel,
        out_shape=jax.ShapeDtypeStruct((B, N, M), x.dtype),
        grid=(B, n_kv),
        in_specs=[
            pl.BlockSpec((1, 1), lambda b, kv: (0, 0),
                         memory_space=pltpu.MemorySpace.SMEM),   # lambda_full
            pl.BlockSpec((1, N, M), lambda b, kv: (b, 0, 0)),    # x
            pl.BlockSpec((M, 3 * HD), lambda b, kv: (0, 0)),     # w_qkv grouped
            pl.BlockSpec((H, D, M), lambda b, kv: (0, 0, 0)),    # w_proj (H,D,M)
            pl.BlockSpec((1, 1, D), lambda b, kv: (0, 0, 0)),    # gamma
        ],
        out_specs=pl.BlockSpec((1, N, M), lambda b, kv: (b, 0, 0)),
        scratch_shapes=[
            pltpu.VMEM((H, N, Dqk), compute_dtype),   # q1 (head-major)
            pltpu.VMEM((H, N, Dqk), compute_dtype),   # q2
            pltpu.VMEM((H, N, Dqk), compute_dtype),   # k1
            pltpu.VMEM((H, N, Dqk), compute_dtype),   # k2
            pltpu.VMEM((H, N, D), compute_dtype),     # v
            pltpu.VMEM((H, N, 1), jnp.float32),       # m1 (running max)
            pltpu.VMEM((H, N, 1), jnp.float32),       # l1 (running sum)
            pltpu.VMEM((H, N, D), jnp.float32),       # acc1 (unnormalized PV)
            pltpu.VMEM((H, N, 1), jnp.float32),       # m2
            pltpu.VMEM((H, N, 1), jnp.float32),       # l2
            pltpu.VMEM((H, N, D), jnp.float32),       # acc2
        ],
        compiler_params=pltpu.CompilerParams(
            dimension_semantics=("parallel", "arbitrary"),
            vmem_limit_bytes=vmem_limit),
    )(lam_full, x_c, w_qkv_g, w_proj_3d, gamma)


# ----------------------------------------------------------------------------
# Pure-JAX f32 reference for verification.
# ----------------------------------------------------------------------------
def _reference_forward(x, params, *, num_heads, head_dim, lambda_init,
                       eps=1e-6):
    B, N, M = x.shape
    D = head_dim
    Dqk = D // 2
    scale = Dqk ** (-0.5)

    qkv = x @ params["w_qkv"].T
    q, k, v = jnp.split(qkv, 3, axis=-1)
    reh = lambda t: t.reshape(B, N, num_heads, D).transpose(0, 2, 1, 3)
    q, k, v = reh(q), reh(k), reh(v)
    q1, q2 = q[..., :Dqk], q[..., Dqk:]
    k1, k2 = k[..., :Dqk], k[..., Dqk:]

    s1 = jnp.einsum("bhnd,bhmd->bhnm", q1, k1) * scale
    s2 = jnp.einsum("bhnd,bhmd->bhnm", q2, k2) * scale
    a1 = jax.nn.softmax(s1, axis=-1)
    a2 = jax.nn.softmax(s2, axis=-1)

    lam1 = jnp.exp(jnp.sum(params["lambda_q1"] * params["lambda_k1"]))
    lam2 = jnp.exp(jnp.sum(params["lambda_q2"] * params["lambda_k2"]))
    lam_full = lam1 - lam2 + lambda_init

    attn = a1 - lam_full * a2
    out = jnp.einsum("bhnm,bhmd->bhnd", attn, v)

    ms = jnp.mean(out * out, axis=-1, keepdims=True)
    out = out * jax.lax.rsqrt(ms + eps) * params["rms_weight"]
    out = out * (1.0 - lambda_init)
    out = out.transpose(0, 2, 1, 3).reshape(B, N, num_heads * D)
    return out @ params["w_proj"].T


if __name__ == "__main__":
    # Small shapes consistent with the module:
    #   modelDim=32, headDim=16 (-> head_dim_qk=8), numHeads=4, seq=8, batch=2
    B, N, MODEL_DIM, HEAD_DIM, NUM_HEADS = 2, 8, 32, 16, 4
    LAYER = 1
    PROJ_DIM = NUM_HEADS * HEAD_DIM
    DQK = HEAD_DIM // 2
    lambda_init = differential_attn_lambda_init(LAYER)

    key = jax.random.PRNGKey(0)
    kx, kqkv, kproj, k1, k2, k3, k4 = jax.random.split(key, 7)

    x = jax.random.normal(kx, (B, N, MODEL_DIM), dtype=jnp.float32)

    params = {
        "w_qkv": 0.02 * jax.random.normal(kqkv, (3 * PROJ_DIM, MODEL_DIM),
                                          dtype=jnp.float32),
        "w_proj": 0.02 * jax.random.normal(kproj, (MODEL_DIM, PROJ_DIM),
                                           dtype=jnp.float32),
        "lambda_q1": 0.1 * jax.random.normal(k1, (DQK,), dtype=jnp.float32),
        "lambda_k1": 0.1 * jax.random.normal(k2, (DQK,), dtype=jnp.float32),
        "lambda_q2": 0.1 * jax.random.normal(k3, (DQK,), dtype=jnp.float32),
        "lambda_k2": 0.1 * jax.random.normal(k4, (DQK,), dtype=jnp.float32),
        "rms_weight": jnp.ones((HEAD_DIM,), dtype=jnp.float32),
    }

    ref = _reference_forward(
        x, params, num_heads=NUM_HEADS, head_dim=HEAD_DIM,
        lambda_init=lambda_init)

    # Full-precision path (tight check).
    out_f32 = differential_attention_forward(
        x, params, num_heads=NUM_HEADS, head_dim=HEAD_DIM,
        lambda_init=lambda_init, compute_dtype=jnp.float32)
    out_f32 = jax.block_until_ready(out_f32)
    assert out_f32.shape == (B, N, MODEL_DIM)
    assert jnp.allclose(out_f32, ref, atol=1e-3, rtol=1e-3)

    # bf16-MXU path (f32 accumulation / softmax / RMSNorm; looser tolerance).
    out_bf16 = differential_attention_forward(
        x, params, num_heads=NUM_HEADS, head_dim=HEAD_DIM,
        lambda_init=lambda_init, compute_dtype=jnp.bfloat16)
    out_bf16 = jax.block_until_ready(out_bf16)
    assert out_bf16.shape == (B, N, MODEL_DIM)
    assert jnp.allclose(out_bf16, ref, atol=2e-2, rtol=2e-2)

    print("KERNEL_OK")
</pallas_src>

<mosaic_0001>
module attributes {stable_mosaic.version = 11 : i64} {
  func.func @_diff_attn_kernel(%arg0: i32, %arg1: i32, %arg2: memref<1x1xf32, #tpu.memory_space<smem>>, %arg3: memref<1x8x32xf32, #tpu.memory_space<vmem>>, %arg4: memref<32x192xf32, #tpu.memory_space<vmem>>, %arg5: memref<4x16x32xf32, #tpu.memory_space<vmem>>, %arg6: memref<1x1x16xf32, #tpu.memory_space<vmem>>, %arg7: memref<1x8x32xf32, #tpu.memory_space<vmem>>, %arg8: memref<4x8x8xf32, #tpu.memory_space<vmem>>, %arg9: memref<4x8x8xf32, #tpu.memory_space<vmem>>, %arg10: memref<4x8x8xf32, #tpu.memory_space<vmem>>, %arg11: memref<4x8x8xf32, #tpu.memory_space<vmem>>, %arg12: memref<4x8x16xf32, #tpu.memory_space<vmem>>, %arg13: memref<4x8x1xf32, #tpu.memory_space<vmem>>, %arg14: memref<4x8x1xf32, #tpu.memory_space<vmem>>, %arg15: memref<4x8x16xf32, #tpu.memory_space<vmem>>, %arg16: memref<4x8x1xf32, #tpu.memory_space<vmem>>, %arg17: memref<4x8x1xf32, #tpu.memory_space<vmem>>, %arg18: memref<4x8x16xf32, #tpu.memory_space<vmem>>) attributes {dimension_semantics = [#tpu.dimension_semantics<parallel>, #tpu.dimension_semantics<arbitrary>], iteration_bounds = array<i64: 2, 1>, scalar_prefetch = 0 : i64, scratch_operands = 11 : i64, tpu.core_type = #tpu.core_type<tc>, window_params = [{transform_indices = @transform_0, window_bounds = array<i64: 1, 1>}, {transform_indices = @transform_1, window_bounds = array<i64: 1, 8, 32>}, {pipeline_mode = #tpu.pipeline_mode<synchronous>, transform_indices = @transform_2, window_bounds = array<i64: 32, 192>}, {pipeline_mode = #tpu.pipeline_mode<synchronous>, transform_indices = @transform_3, window_bounds = array<i64: 4, 16, 32>}, {pipeline_mode = #tpu.pipeline_mode<synchronous>, transform_indices = @transform_4, window_bounds = array<i64: 1, 1, 16>}, {transform_indices = @transform_5, window_bounds = array<i64: 1, 8, 32>}]} {
    %c0_i32 = arith.constant 0 : i32
    %0 = arith.cmpi eq, %arg1, %c0_i32 : i32
    %1 = arith.extui %0 : i1 to i32
    %c0_i32_0 = arith.constant 0 : i32
    %2 = arith.cmpi ne, %1, %c0_i32_0 : i32
    scf.if %2 {
      %c0_57 = arith.constant 0 : index
      %c0_58 = arith.constant 0 : index
      %c0_59 = arith.constant 0 : index
      %62 = vector.load %arg3[%c0_57, %c0_58, %c0_59] : memref<1x8x32xf32, #tpu.memory_space<vmem>>, vector<1x8x32xf32>
      %63 = vector.shape_cast %62 : vector<1x8x32xf32> to vector<8x32xf32>
      %c0_60 = arith.constant 0 : index
      %c0_61 = arith.constant 0 : index
      %64 = vector.load %arg4[%c0_60, %c0_61] : memref<32x192xf32, #tpu.memory_space<vmem>>, vector<32x192xf32>
      %cst_62 = arith.constant dense<0.000000e+00> : vector<8x192xf32>
      %65 = tpu.matmul %63, %64, %cst_62 {dimension_numbers = #tpu.dot_dimension_numbers<[1], [0], [0], [1], [0, 0, 1, 1], [], []>} : vector<8x32xf32>, vector<32x192xf32>, vector<8x192xf32> -> vector<8x192xf32>
      %66 = vector.extract_strided_slice %65 {offsets = [0, 0], sizes = [8, 8], strides = [1, 1]} : vector<8x192xf32> to vector<8x8xf32>
      %c0_63 = arith.constant 0 : index
      %c0_64 = arith.constant 0 : index
      %c0_65 = arith.constant 0 : index
      %67 = vector.load %arg8[%c0_63, %c0_64, %c0_65] : memref<4x8x8xf32, #tpu.memory_space<vmem>>, vector<1x8x8xf32>
      %68 = vector.shape_cast %67 : vector<1x8x8xf32> to vector<8x8xf32>
      %69 = vector.shape_cast %66 : vector<8x8xf32> to vector<1x8x8xf32>
      tpu.vector_store %arg8[%c0_63, %c0_64, %c0_65], %69 {strides = array<i32>} : memref<4x8x8xf32, #tpu.memory_space<vmem>>, vector<1x8x8xf32>,
      %70 = vector.extract_strided_slice %65 {offsets = [0, 32], sizes = [8, 8], strides = [1, 1]} : vector<8x192xf32> to vector<8x8xf32>
      %c0_66 = arith.constant 0 : index
      %c0_67 = arith.constant 0 : index
      %c0_68 = arith.constant 0 : index
      %71 = vector.load %arg9[%c0_66, %c0_67, %c0_68] : memref<4x8x8xf32, #tpu.memory_space<vmem>>, vector<1x8x8xf32>
      %72 = vector.shape_cast %71 : vector<1x8x8xf32> to vector<8x8xf32>
      %73 = vector.shape_cast %70 : vector<8x8xf32> to vector<1x8x8xf32>
      tpu.vector_store %arg9[%c0_66, %c0_67, %c0_68], %73 {strides = array<i32>} : memref<4x8x8xf32, #tpu.memory_space<vmem>>, vector<1x8x8xf32>,
      %74 = vector.extract_strided_slice %65 {offsets = [0, 64], sizes = [8, 8], strides = [1, 1]} : vector<8x192xf32> to vector<8x8xf32>
      %c0_69 = arith.constant 0 : index
      %c0_70 = arith.constant 0 : index
      %c0_71 = arith.constant 0 : index
      %75 = vector.load %arg10[%c0_69, %c0_70, %c0_71] : memref<4x8x8xf32, #tpu.memory_space<vmem>>, vector<1x8x8xf32>
      %76 = vector.shape_cast %75 : vector<1x8x8xf32> to vector<8x8xf32>
      %77 = vector.shape_cast %74 : vector<8x8xf32> to vector<1x8x8xf32>
      tpu.vector_store %arg10[%c0_69, %c0_70, %c0_71], %77 {strides = array<i32>} : memref<4x8x8xf32, #tpu.memory_space<vmem>>, vector<1x8x8xf32>,
      %78 = vector.extract_strided_slice %65 {offsets = [0, 96], sizes = [8, 8], strides = [1, 1]} : vector<8x192xf32> to vector<8x8xf32>
      %c0_72 = arith.constant 0 : index
      %c0_73 = arith.constant 0 : index
      %c0_74 = arith.constant 0 : index
      %79 = vector.load %arg11[%c0_72, %c0_73, %c0_74] : memref<4x8x8xf32, #tpu.memory_space<vmem>>, vector<1x8x8xf32>
      %80 = vector.shape_cast %79 : vector<1x8x8xf32> to vector<8x8xf32>
      %81 = vector.shape_cast %78 : vector<8x8xf32> to vector<1x8x8xf32>
      tpu.vector_store %arg11[%c0_72, %c0_73, %c0_74], %81 {strides = array<i32>} : memref<4x8x8xf32, #tpu.memory_space<vmem>>, vector<1x8x8xf32>,
      %82 = vector.extract_strided_slice %65 {offsets = [0, 128], sizes = [8, 16], strides = [1, 1]} : vector<8x192xf32> to vector<8x16xf32>
      %c0_75 = arith.constant 0 : index
      %c0_76 = arith.constant 0 : index
      %c0_77 = arith.constant 0 : index
      %83 = vector.load %arg12[%c0_75, %c0_76, %c0_77] : memref<4x8x16xf32, #tpu.memory_space<vmem>>, vector<1x8x16xf32>
      %84 = vector.shape_cast %83 : vector<1x8x16xf32> to vector<8x16xf32>
      %85 = vector.shape_cast %82 : vector<8x16xf32> to vector<1x8x16xf32>
      tpu.vector_store %arg12[%c0_75, %c0_76, %c0_77], %85 {strides = array<i32>} : memref<4x8x16xf32, #tpu.memory_space<vmem>>, vector<1x8x16xf32>,
      %86 = vector.extract_strided_slice %65 {offsets = [0, 8], sizes = [8, 8], strides = [1, 1]} : vector<8x192xf32> to vector<8x8xf32>
      %c1 = arith.constant 1 : index
      %c0_78 = arith.constant 0 : index
      %c0_79 = arith.constant 0 : index
      %87 = vector.load %arg8[%c1, %c0_78, %c0_79] : memref<4x8x8xf32, #tpu.memory_space<vmem>>, vector<1x8x8xf32>
      %88 = vector.shape_cast %87 : vector<1x8x8xf32> to vector<8x8xf32>
      %89 = vector.shape_cast %86 : vector<8x8xf32> to vector<1x8x8xf32>
      tpu.vector_store %arg8[%c1, %c0_78, %c0_79], %89 {strides = array<i32>} : memref<4x8x8xf32, #tpu.memory_space<vmem>>, vector<1x8x8xf32>,
      %90 = vector.extract_strided_slice %65 {offsets = [0, 40], sizes = [8, 8], strides = [1, 1]} : vector<8x192xf32> to vector<8x8xf32>
      %c1_80 = arith.constant 1 : index
      %c0_81 = arith.constant 0 : index
      %c0_82 = arith.constant 0 : index
      %91 = vector.load %arg9[%c1_80, %c0_81, %c0_82] : memref<4x8x8xf32, #tpu.memory_space<vmem>>, vector<1x8x8xf32>
      %92 = vector.shape_cast %91 : vector<1x8x8xf32> to vector<8x8xf32>
      %93 = vector.shape_cast %90 : vector<8x8xf32> to vector<1x8x8xf32>
      tpu.vector_store %arg9[%c1_80, %c0_81, %c0_82], %93 {strides = array<i32>} : memref<4x8x8xf32, #tpu.memory_space<vmem>>, vector<1x8x8xf32>,
      %94 = vector.extract_strided_slice %65 {offsets = [0, 72], sizes = [8, 8], strides = [1, 1]} : vector<8x192xf32> to vector<8x8xf32>
      %c1_83 = arith.constant 1 : index
      %c0_84 = arith.constant 0 : index
      %c0_85 = arith.constant 0 : index
      %95 = vector.load %arg10[%c1_83, %c0_84, %c0_85] : memref<4x8x8xf32, #tpu.memory_space<vmem>>, vector<1x8x8xf32>
      %96 = vector.shape_cast %95 : vector<1x8x8xf32> to vector<8x8xf32>
      %97 = vector.shape_cast %94 : vector<8x8xf32> to vector<1x8x8xf32>
      tpu.vector_store %arg10[%c1_83, %c0_84, %c0_85], %97 {strides = array<i32>} : memref<4x8x8xf32, #tpu.memory_space<vmem>>, vector<1x8x8xf32>,
      %98 = vector.extract_strided_slice %65 {offsets = [0, 104], sizes = [8, 8], strides = [1, 1]} : vector<8x192xf32> to vector<8x8xf32>
      %c1_86 = arith.constant 1 : index
      %c0_87 = arith.constant 0 : index
      %c0_88 = arith.constant 0 : index
      %99 = vector.load %arg11[%c1_86, %c0_87, %c0_88] : memref<4x8x8xf32, #tpu.memory_space<vmem>>, vector<1x8x8xf32>
      %100 = vector.shape_cast %99 : vector<1x8x8xf32> to vector<8x8xf32>
      %101 = vector.shape_cast %98 : vector<8x8xf32> to vector<1x8x8xf32>
      tpu.vector_store %arg11[%c1_86, %c0_87, %c0_88], %101 {strides = array<i32>} : memref<4x8x8xf32, #tpu.memory_space<vmem>>, vector<1x8x8xf32>,
      %102 = vector.extract_strided_slice %65 {offsets = [0, 144], sizes = [8, 16], strides = [1, 1]} : vector<8x192xf32> to vector<8x16xf32>
      %c1_89 = arith.constant 1 : index
      %c0_90 = arith.constant 0 : index
      %c0_91 = arith.constant 0 : index
      %103 = vector.load %arg12[%c1_89, %c0_90, %c0_91] : memref<4x8x16xf32, #tpu.memory_space<vmem>>, vector<1x8x16xf32>
      %104 = vector.shape_cast %103 : vector<1x8x16xf32> to vector<8x16xf32>
      %105 = vector.shape_cast %102 : vector<8x16xf32> to vector<1x8x16xf32>
      tpu.vector_store %arg12[%c1_89, %c0_90, %c0_91], %105 {strides = array<i32>} : memref<4x8x16xf32, #tpu.memory_space<vmem>>, vector<1x8x16xf32>,
      %106 = vector.extract_strided_slice %65 {offsets = [0, 16], sizes = [8, 8], strides = [1, 1]} : vector<8x192xf32> to vector<8x8xf32>
      %c2 = arith.constant 2 : index
      %c0_92 = arith.constant 0 : index
      %c0_93 = arith.constant 0 : index
      %107 = vector.load %arg8[%c2, %c0_92, %c0_93] : memref<4x8x8xf32, #tpu.memory_space<vmem>>, vector<1x8x8xf32>
      %108 = vector.shape_cast %107 : vector<1x8x8xf32> to vector<8x8xf32>
      %109 = vector.shape_cast %106 : vector<8x8xf32> to vector<1x8x8xf32>
      tpu.vector_store %arg8[%c2, %c0_92, %c0_93], %109 {strides = array<i32>} : memref<4x8x8xf32, #tpu.memory_space<vmem>>, vector<1x8x8xf32>,
      %110 = vector.extract_strided_slice %65 {offsets = [0, 48], sizes = [8, 8], strides = [1, 1]} : vector<8x192xf32> to vector<8x8xf32>
      %c2_94 = arith.constant 2 : index
      %c0_95 = arith.constant 0 : index
      %c0_96 = arith.constant 0 : index
      %111 = vector.load %arg9[%c2_94, %c0_95, %c0_96] : memref<4x8x8xf32, #tpu.memory_space<vmem>>, vector<1x8x8xf32>
      %112 = vector.shape_cast %111 : vector<1x8x8xf32> to vector<8x8xf32>
      %113 = vector.shape_cast %110 : vector<8x8xf32> to vector<1x8x8xf32>
      tpu.vector_store %arg9[%c2_94, %c0_95, %c0_96], %113 {strides = array<i32>} : memref<4x8x8xf32, #tpu.memory_space<vmem>>, vector<1x8x8xf32>,
      %114 = vector.extract_strided_slice %65 {offsets = [0, 80], sizes = [8, 8], strides = [1, 1]} : vector<8x192xf32> to vector<8x8xf32>
      %c2_97 = arith.constant 2 : index
      %c0_98 = arith.constant 0 : index
      %c0_99 = arith.constant 0 : index
      %115 = vector.load %arg10[%c2_97, %c0_98, %c0_99] : memref<4x8x8xf32, #tpu.memory_space<vmem>>, vector<1x8x8xf32>
      %116 = vector.shape_cast %115 : vector<1x8x8xf32> to vector<8x8xf32>
      %117 = vector.shape_cast %114 : vector<8x8xf32> to vector<1x8x8xf32>
      tpu.vector_store %arg10[%c2_97, %c0_98, %c0_99], %117 {strides = array<i32>} : memref<4x8x8xf32, #tpu.memory_space<vmem>>, vector<1x8x8xf32>,
      %118 = vector.extract_strided_slice %65 {offsets = [0, 112], sizes = [8, 8], strides = [1, 1]} : vector<8x192xf32> to vector<8x8xf32>
      %c2_100 = arith.constant 2 : index
      %c0_101 = arith.constant 0 : index
      %c0_102 = arith.constant 0 : index
      %119 = vector.load %arg11[%c2_100, %c0_101, %c0_102] : memref<4x8x8xf32, #tpu.memory_space<vmem>>, vector<1x8x8xf32>
      %120 = vector.shape_cast %119 : vector<1x8x8xf32> to vector<8x8xf32>
      %121 = vector.shape_cast %118 : vector<8x8xf32> to vector<1x8x8xf32>
      tpu.vector_store %arg11[%c2_100, %c0_101, %c0_102], %121 {strides = array<i32>} : memref<4x8x8xf32, #tpu.memory_space<vmem>>, vector<1x8x8xf32>,
      %122 = vector.extract_strided_slice %65 {offsets = [0, 160], sizes = [8, 16], strides = [1, 1]} : vector<8x192xf32> to vector<8x16xf32>
      %c2_103 = arith.constant 2 : index
      %c0_104 = arith.constant 0 : index
      %c0_105 = arith.constant 0 : index
      %123 = vector.load %arg12[%c2_103, %c0_104, %c0_105] : memref<4x8x16xf32, #tpu.memory_space<vmem>>, vector<1x8x16xf32>
      %124 = vector.shape_cast %123 : vector<1x8x16xf32> to vector<8x16xf32>
      %125 = vector.shape_cast %122 : vector<8x16xf32> to vector<1x8x16xf32>
      tpu.vector_store %arg12[%c2_103, %c0_104, %c0_105], %125 {strides = array<i32>} : memref<4x8x16xf32, #tpu.memory_space<vmem>>, vector<1x8x16xf32>,
      %126 = vector.extract_strided_slice %65 {offsets = [0, 24], sizes = [8, 8], strides = [1, 1]} : vector<8x192xf32> to vector<8x8xf32>
      %c3 = arith.constant 3 : index
      %c0_106 = arith.constant 0 : index
      %c0_107 = arith.constant 0 : index
      %127 = vector.load %arg8[%c3, %c0_106, %c0_107] : memref<4x8x8xf32, #tpu.memory_space<vmem>>, vector<1x8x8xf32>
      %128 = vector.shape_cast %127 : vector<1x8x8xf32> to vector<8x8xf32>
      %129 = vector.shape_cast %126 : vector<8x8xf32> to vector<1x8x8xf32>
      tpu.vector_store %arg8[%c3, %c0_106, %c0_107], %129 {strides = array<i32>} : memref<4x8x8xf32, #tpu.memory_space<vmem>>, vector<1x8x8xf32>,
      %130 = vector.extract_strided_slice %65 {offsets = [0, 56], sizes = [8, 8], strides = [1, 1]} : vector<8x192xf32> to vector<8x8xf32>
      %c3_108 = arith.constant 3 : index
      %c0_109 = arith.constant 0 : index
      %c0_110 = arith.constant 0 : index
      %131 = vector.load %arg9[%c3_108, %c0_109, %c0_110] : memref<4x8x8xf32, #tpu.memory_space<vmem>>, vector<1x8x8xf32>
      %132 = vector.shape_cast %131 : vector<1x8x8xf32> to vector<8x8xf32>
      %133 = vector.shape_cast %130 : vector<8x8xf32> to vector<1x8x8xf32>
      tpu.vector_store %arg9[%c3_108, %c0_109, %c0_110], %133 {strides = array<i32>} : memref<4x8x8xf32, #tpu.memory_space<vmem>>, vector<1x8x8xf32>,
      %134 = vector.extract_strided_slice %65 {offsets = [0, 88], sizes = [8, 8], strides = [1, 1]} : vector<8x192xf32> to vector<8x8xf32>
      %c3_111 = arith.constant 3 : index
      %c0_112 = arith.constant 0 : index
      %c0_113 = arith.constant 0 : index
      %135 = vector.load %arg10[%c3_111, %c0_112, %c0_113] : memref<4x8x8xf32, #tpu.memory_space<vmem>>, vector<1x8x8xf32>
      %136 = vector.shape_cast %135 : vector<1x8x8xf32> to vector<8x8xf32>
      %137 = vector.shape_cast %134 : vector<8x8xf32> to vector<1x8x8xf32>
      tpu.vector_store %arg10[%c3_111, %c0_112, %c0_113], %137 {strides = array<i32>} : memref<4x8x8xf32, #tpu.memory_space<vmem>>, vector<1x8x8xf32>,
      %138 = vector.extract_strided_slice %65 {offsets = [0, 120], sizes = [8, 8], strides = [1, 1]} : vector<8x192xf32> to vector<8x8xf32>
      %c3_114 = arith.constant 3 : index
      %c0_115 = arith.constant 0 : index
      %c0_116 = arith.constant 0 : index
      %139 = vector.load %arg11[%c3_114, %c0_115, %c0_116] : memref<4x8x8xf32, #tpu.memory_space<vmem>>, vector<1x8x8xf32>
      %140 = vector.shape_cast %139 : vector<1x8x8xf32> to vector<8x8xf32>
      %141 = vector.shape_cast %138 : vector<8x8xf32> to vector<1x8x8xf32>
      tpu.vector_store %arg11[%c3_114, %c0_115, %c0_116], %141 {strides = array<i32>} : memref<4x8x8xf32, #tpu.memory_space<vmem>>, vector<1x8x8xf32>,
      %142 = vector.extract_strided_slice %65 {offsets = [0, 176], sizes = [8, 16], strides = [1, 1]} : vector<8x192xf32> to vector<8x16xf32>
      %c3_117 = arith.constant 3 : index
      %c0_118 = arith.constant 0 : index
      %c0_119 = arith.constant 0 : index
      %143 = vector.load %arg12[%c3_117, %c0_118, %c0_119] : memref<4x8x16xf32, #tpu.memory_space<vmem>>, vector<1x8x16xf32>
      %144 = vector.shape_cast %143 : vector<1x8x16xf32> to vector<8x16xf32>
      %145 = vector.shape_cast %142 : vector<8x16xf32> to vector<1x8x16xf32>
      tpu.vector_store %arg12[%c3_117, %c0_118, %c0_119], %145 {strides = array<i32>} : memref<4x8x16xf32, #tpu.memory_space<vmem>>, vector<1x8x16xf32>,
      %cst_120 = arith.constant 0xFF800000 : f32
      %146 = vector.broadcast %cst_120 : f32 to vector<4x8x1xf32>
      %c0_121 = arith.constant 0 : index
      %c0_122 = arith.constant 0 : index
      %c0_123 = arith.constant 0 : index
      %147 = vector.load %arg13[%c0_121, %c0_122, %c0_123] : memref<4x8x1xf32, #tpu.memory_space<vmem>>, vector<4x8x1xf32>
      tpu.vector_store %arg13[%c0_121, %c0_122, %c0_123], %146 {strides = array<i32>} : memref<4x8x1xf32, #tpu.memory_space<vmem>>, vector<4x8x1xf32>,
      %cst_124 = arith.constant 0xFF800000 : f32
      %148 = vector.broadcast %cst_124 : f32 to vector<4x8x1xf32>
      %c0_125 = arith.constant 0 : index
      %c0_126 = arith.constant 0 : index
      %c0_127 = arith.constant 0 : index
      %149 = vector.load %arg16[%c0_125, %c0_126, %c0_127] : memref<4x8x1xf32, #tpu.memory_space<vmem>>, vector<4x8x1xf32>
      tpu.vector_store %arg16[%c0_125, %c0_126, %c0_127], %148 {strides = array<i32>} : memref<4x8x1xf32, #tpu.memory_space<vmem>>, vector<4x8x1xf32>,
      %cst_128 = arith.constant 0.000000e+00 : f32
      %150 = vector.broadcast %cst_128 : f32 to vector<4x8x1xf32>
      %c0_129 = arith.constant 0 : index
      %c0_130 = arith.constant 0 : index
      %c0_131 = arith.constant 0 : index
      %151 = vector.load %arg14[%c0_129, %c0_130, %c0_131] : memref<4x8x1xf32, #tpu.memory_space<vmem>>, vector<4x8x1xf32>
      tpu.vector_store %arg14[%c0_129, %c0_130, %c0_131], %150 {strides = array<i32>} : memref<4x8x1xf32, #tpu.memory_space<vmem>>, vector<4x8x1xf32>,
      %cst_132 = arith.constant 0.000000e+00 : f32
      %152 = vector.broadcast %cst_132 : f32 to vector<4x8x1xf32>
      %c0_133 = arith.constant 0 : index
      %c0_134 = arith.constant 0 : index
      %c0_135 = arith.constant 0 : index
      %153 = vector.load %arg17[%c0_133, %c0_134, %c0_135] : memref<4x8x1xf32, #tpu.memory_space<vmem>>, vector<4x8x1xf32>
      tpu.vector_store %arg17[%c0_133, %c0_134, %c0_135], %152 {strides = array<i32>} : memref<4x8x1xf32, #tpu.memory_space<vmem>>, vector<4x8x1xf32>,
      %cst_136 = arith.constant 0.000000e+00 : f32
      %154 = vector.broadcast %cst_136 : f32 to vector<4x8x16xf32>
      %c0_137 = arith.constant 0 : index
      %c0_138 = arith.constant 0 : index
      %c0_139 = arith.constant 0 : index
      %155 = vector.load %arg15[%c0_137, %c0_138, %c0_139] : memref<4x8x16xf32, #tpu.memory_space<vmem>>, vector<4x8x16xf32>
      tpu.vector_store %arg15[%c0_137, %c0_138, %c0_139], %154 {strides = array<i32>} : memref<4x8x16xf32, #tpu.memory_space<vmem>>, vector<4x8x16xf32>,
      %cst_140 = arith.constant 0.000000e+00 : f32
      %156 = vector.broadcast %cst_140 : f32 to vector<4x8x16xf32>
      %c0_141 = arith.constant 0 : index
      %c0_142 = arith.constant 0 : index
      %c0_143 = arith.constant 0 : index
      %157 = vector.load %arg18[%c0_141, %c0_142, %c0_143] : memref<4x8x16xf32, #tpu.memory_space<vmem>>, vector<4x8x16xf32>
      tpu.vector_store %arg18[%c0_141, %c0_142, %c0_143], %156 {strides = array<i32>} : memref<4x8x16xf32, #tpu.memory_space<vmem>>, vector<4x8x16xf32>,
    } else {
    }
    %c8_i32 = arith.constant 8 : i32
    %3 = arith.muli %arg1, %c8_i32 : i32
    %4 = tpu.assume_multiple %3, 8 : i32
    %c0 = arith.constant 0 : index
    %c0_1 = arith.constant 0 : index
    %c0_2 = arith.constant 0 : index
    %5 = vector.load %arg8[%c0, %c0_1, %c0_2] : memref<4x8x8xf32, #tpu.memory_space<vmem>>, vector<4x8x8xf32>
    %c0_3 = arith.constant 0 : index
    %c0_4 = arith.constant 0 : index
    %c0_5 = arith.constant 0 : index
    %6 = vector.load %arg9[%c0_3, %c0_4, %c0_5] : memref<4x8x8xf32, #tpu.memory_space<vmem>>, vector<4x8x8xf32>
    %c0_6 = arith.constant 0 : index
    %7 = arith.index_cast %4 : i32 to index
    %c0_7 = arith.constant 0 : index
    %8 = vector.load %arg10[%c0_6, %7, %c0_7] : memref<4x8x8xf32, #tpu.memory_space<vmem>>, vector<4x8x8xf32>
    %c0_8 = arith.constant 0 : index
    %9 = arith.index_cast %4 : i32 to index
    %c0_9 = arith.constant 0 : index
    %10 = vector.load %arg11[%c0_8, %9, %c0_9] : memref<4x8x8xf32, #tpu.memory_space<vmem>>, vector<4x8x8xf32>
    %c0_10 = arith.constant 0 : index
    %11 = arith.index_cast %4 : i32 to index
    %c0_11 = arith.constant 0 : index
    %12 = vector.load %arg12[%c0_10, %11, %c0_11] : memref<4x8x16xf32, #tpu.memory_space<vmem>>, vector<4x8x16xf32>
    "tpu.trace_start"() <{level = 10 : i32, message = "hqd,hkd->hqk"}> : () -> ()
    %cst = arith.constant dense<0.000000e+00> : vector<4x8x8xf32>
    %13 = tpu.matmul %5, %8, %cst {dimension_numbers = #tpu.dot_dimension_numbers<[2], [2], [1], [1], [0, 0, 0, 1, 1, 1], [0], [0]>} : vector<4x8x8xf32>, vector<4x8x8xf32>, vector<4x8x8xf32> -> vector<4x8x8xf32>
    %cst_12 = arith.constant dense<0.000000e+00> : vector<4x8x8xf32>
    %14 = tpu.matmul %6, %10, %cst_12 {dimension_numbers = #tpu.dot_dimension_numbers<[2], [2], [1], [1], [0, 0, 0, 1, 1, 1], [0], [0]>} : vector<4x8x8xf32>, vector<4x8x8xf32>, vector<4x8x8xf32> -> vector<4x8x8xf32>
    "tpu.trace_stop"() : () -> ()
    %c0_13 = arith.constant 0 : index
    %c0_14 = arith.constant 0 : index
    %c0_15 = arith.constant 0 : index
    %15 = vector.load %arg13[%c0_13, %c0_14, %c0_15] : memref<4x8x1xf32, #tpu.memory_space<vmem>>, vector<4x8x1xf32>
    %cst_16 = arith.constant dense<0xFF800000> : vector<4x8xf32>
    %16 = vector.multi_reduction <maximumf>, %13, %cst_16 [2] : vector<4x8x8xf32> to vector<4x8xf32>
    %17 = vector.shape_cast %16 : vector<4x8xf32> to vector<4x8x1xf32>
    %18 = arith.maximumf %15, %17 : vector<4x8x1xf32>
    %19 = arith.subf %15, %18 : vector<4x8x1xf32>
    %20 = math.exp %19 : vector<4x8x1xf32>
    %21 = vector.broadcast %18 : vector<4x8x1xf32> to vector<4x8x8xf32>
    %22 = arith.subf %13, %21 : vector<4x8x8xf32>
    %23 = math.exp %22 : vector<4x8x8xf32>
    %c0_17 = arith.constant 0 : index
    %c0_18 = arith.constant 0 : index
    %c0_19 = arith.constant 0 : index
    %24 = vector.load %arg14[%c0_17, %c0_18, %c0_19] : memref<4x8x1xf32, #tpu.memory_space<vmem>>, vector<4x8x1xf32>
    %25 = arith.mulf %20, %24 : vector<4x8x1xf32>
    %cst_20 = arith.constant dense<0.000000e+00> : vector<4x8xf32>
    %26 = vector.multi_reduction <add>, %23, %cst_20 [2] : vector<4x8x8xf32> to vector<4x8xf32>
    %27 = vector.shape_cast %26 : vector<4x8xf32> to vector<4x8x1xf32>
    %28 = arith.addf %25, %27 : vector<4x8x1xf32>
    %c0_21 = arith.constant 0 : index
    %c0_22 = arith.constant 0 : index
    %c0_23 = arith.constant 0 : index
    %29 = vector.load %arg14[%c0_21, %c0_22, %c0_23] : memref<4x8x1xf32, #tpu.memory_space<vmem>>, vector<4x8x1xf32>
    tpu.vector_store %arg14[%c0_21, %c0_22, %c0_23], %28 {strides = array<i32>} : memref<4x8x1xf32, #tpu.memory_space<vmem>>, vector<4x8x1xf32>,
    %c0_24 = arith.constant 0 : index
    %c0_25 = arith.constant 0 : index
    %c0_26 = arith.constant 0 : index
    %30 = vector.load %arg15[%c0_24, %c0_25, %c0_26] : memref<4x8x16xf32, #tpu.memory_space<vmem>>, vector<4x8x16xf32>
    %31 = vector.broadcast %20 : vector<4x8x1xf32> to vector<4x8x16xf32>
    %32 = arith.mulf %31, %30 : vector<4x8x16xf32>
    "tpu.trace_start"() <{level = 10 : i32, message = "hqk,hkd->hqd"}> : () -> ()
    %cst_27 = arith.constant dense<0.000000e+00> : vector<4x8x16xf32>
    %33 = tpu.matmul %23, %12, %cst_27 {dimension_numbers = #tpu.dot_dimension_numbers<[2], [1], [1], [2], [0, 0, 0, 1, 1, 2], [0], [0]>} : vector<4x8x8xf32>, vector<4x8x16xf32>, vector<4x8x16xf32> -> vector<4x8x16xf32>
    "tpu.trace_stop"() : () -> ()
    %34 = arith.addf %32, %33 : vector<4x8x16xf32>
    %c0_28 = arith.constant 0 : index
    %c0_29 = arith.constant 0 : index
    %c0_30 = arith.constant 0 : index
    %35 = vector.load %arg15[%c0_28, %c0_29, %c0_30] : memref<4x8x16xf32, #tpu.memory_space<vmem>>, vector<4x8x16xf32>
    tpu.vector_store %arg15[%c0_28, %c0_29, %c0_30], %34 {strides = array<i32>} : memref<4x8x16xf32, #tpu.memory_space<vmem>>, vector<4x8x16xf32>,
    %c0_31 = arith.constant 0 : index
    %c0_32 = arith.constant 0 : index
    %c0_33 = arith.constant 0 : index
    %36 = vector.load %arg13[%c0_31, %c0_32, %c0_33] : memref<4x8x1xf32, #tpu.memory_space<vmem>>, vector<4x8x1xf32>
    tpu.vector_store %arg13[%c0_31, %c0_32, %c0_33], %18 {strides = array<i32>} : memref<4x8x1xf32, #tpu.memory_space<vmem>>, vector<4x8x1xf32>,
    %c0_34 = arith.constant 0 : index
    %c0_35 = arith.constant 0 : index
    %c0_36 = arith.constant 0 : index
    %37 = vector.load %arg16[%c0_34, %c0_35, %c0_36] : memref<4x8x1xf32, #tpu.memory_space<vmem>>, vector<4x8x1xf32>
    %cst_37 = arith.constant dense<0xFF800000> : vector<4x8xf32>
    %38 = vector.multi_reduction <maximumf>, %14, %cst_37 [2] : vector<4x8x8xf32> to vector<4x8xf32>
    %39 = vector.shape_cast %38 : vector<4x8xf32> to vector<4x8x1xf32>
    %40 = arith.maximumf %37, %39 : vector<4x8x1xf32>
    %41 = arith.subf %37, %40 : vector<4x8x1xf32>
    %42 = math.exp %41 : vector<4x8x1xf32>
    %43 = vector.broadcast %40 : vector<4x8x1xf32> to vector<4x8x8xf32>
    %44 = arith.subf %14, %43 : vector<4x8x8xf32>
    %45 = math.exp %44 : vector<4x8x8xf32>
    %c0_38 = arith.constant 0 : index
    %c0_39 = arith.constant 0 : index
    %c0_40 = arith.constant 0 : index
    %46 = vector.load %arg17[%c0_38, %c0_39, %c0_40] : memref<4x8x1xf32, #tpu.memory_space<vmem>>, vector<4x8x1xf32>
    %47 = arith.mulf %42, %46 : vector<4x8x1xf32>
    %cst_41 = arith.constant dense<0.000000e+00> : vector<4x8xf32>
    %48 = vector.multi_reduction <add>, %45, %cst_41 [2] : vector<4x8x8xf32> to vector<4x8xf32>
    %49 = vector.shape_cast %48 : vector<4x8xf32> to vector<4x8x1xf32>
    %50 = arith.addf %47, %49 : vector<4x8x1xf32>
    %c0_42 = arith.constant 0 : index
    %c0_43 = arith.constant 0 : index
    %c0_44 = arith.constant 0 : index
    %51 = vector.load %arg17[%c0_42, %c0_43, %c0_44] : memref<4x8x1xf32, #tpu.memory_space<vmem>>, vector<4x8x1xf32>
    tpu.vector_store %arg17[%c0_42, %c0_43, %c0_44], %50 {strides = array<i32>} : memref<4x8x1xf32, #tpu.memory_space<vmem>>, vector<4x8x1xf32>,
    %c0_45 = arith.constant 0 : index
    %c0_46 = arith.constant 0 : index
    %c0_47 = arith.constant 0 : index
    %52 = vector.load %arg18[%c0_45, %c0_46, %c0_47] : memref<4x8x16xf32, #tpu.memory_space<vmem>>, vector<4x8x16xf32>
    %53 = vector.broadcast %42 : vector<4x8x1xf32> to vector<4x8x16xf32>
    %54 = arith.mulf %53, %52 : vector<4x8x16xf32>
    "tpu.trace_start"() <{level = 10 : i32, message = "hqk,hkd->hqd"}> : () -> ()
    %cst_48 = arith.constant dense<0.000000e+00> : vector<4x8x16xf32>
    %55 = tpu.matmul %45, %12, %cst_48 {dimension_numbers = #tpu.dot_dimension_numbers<[2], [1], [1], [2], [0, 0, 0, 1, 1, 2], [0], [0]>} : vector<4x8x8xf32>, vector<4x8x16xf32>, vector<4x8x16xf32> -> vector<4x8x16xf32>
    "tpu.trace_stop"() : () -> ()
    %56 = arith.addf %54, %55 : vector<4x8x16xf32>
    %c0_49 = arith.constant 0 : index
    %c0_50 = arith.constant 0 : index
    %c0_51 = arith.constant 0 : index
    %57 = vector.load %arg18[%c0_49, %c0_50, %c0_51] : memref<4x8x16xf32, #tpu.memory_space<vmem>>, vector<4x8x16xf32>
    tpu.vector_store %arg18[%c0_49, %c0_50, %c0_51], %56 {strides = array<i32>} : memref<4x8x16xf32, #tpu.memory_space<vmem>>, vector<4x8x16xf32>,
    %c0_52 = arith.constant 0 : index
    %c0_53 = arith.constant 0 : index
    %c0_54 = arith.constant 0 : index
    %58 = vector.load %arg16[%c0_52, %c0_53, %c0_54] : memref<4x8x1xf32, #tpu.memory_space<vmem>>, vector<4x8x1xf32>
    tpu.vector_store %arg16[%c0_52, %c0_53, %c0_54], %40 {strides = array<i32>} : memref<4x8x1xf32, #tpu.memory_space<vmem>>, vector<4x8x1xf32>,
    %c0_i32_55 = arith.constant 0 : i32
    %59 = arith.cmpi eq, %arg1, %c0_i32_55 : i32
    %60 = arith.extui %59 : i1 to i32
    %c0_i32_56 = arith.constant 0 : i32
    %61 = arith.cmpi ne, %60, %c0_i32_56 : i32
    scf.if %61 {
      %c0_57 = arith.constant 0 : index
      %c0_58 = arith.constant 0 : index
      %62 = memref.load %arg2[%c0_57, %c0_58] : memref<1x1xf32, #tpu.memory_space<smem>>
      %c0_59 = arith.constant 0 : index
      %c0_60 = arith.constant 0 : index
      %c0_61 = arith.constant 0 : index
      %63 = vector.load %arg14[%c0_59, %c0_60, %c0_61] : memref<4x8x1xf32, #tpu.memory_space<vmem>>, vector<4x8x1xf32>
      %cst_62 = arith.constant 1.000000e+00 : f32
      %64 = vector.broadcast %cst_62 : f32 to vector<4x8x1xf32>
      %65 = arith.divf %64, %63 : vector<4x8x1xf32>
      %c0_63 = arith.constant 0 : index
      %c0_64 = arith.constant 0 : index
      %c0_65 = arith.constant 0 : index
      %66 = vector.load %arg17[%c0_63, %c0_64, %c0_65] : memref<4x8x1xf32, #tpu.memory_space<vmem>>, vector<4x8x1xf32>
      %cst_66 = arith.constant 1.000000e+00 : f32
      %67 = vector.broadcast %cst_66 : f32 to vector<4x8x1xf32>
      %68 = arith.divf %67, %66 : vector<4x8x1xf32>
      %c0_67 = arith.constant 0 : index
      %c0_68 = arith.constant 0 : index
      %c0_69 = arith.constant 0 : index
      %69 = vector.load %arg15[%c0_67, %c0_68, %c0_69] : memref<4x8x16xf32, #tpu.memory_space<vmem>>, vector<4x8x16xf32>
      %70 = vector.broadcast %65 : vector<4x8x1xf32> to vector<4x8x16xf32>
      %71 = arith.mulf %69, %70 : vector<4x8x16xf32>
      %c0_70 = arith.constant 0 : index
      %c0_71 = arith.constant 0 : index
      %c0_72 = arith.constant 0 : index
      %72 = vector.load %arg18[%c0_70, %c0_71, %c0_72] : memref<4x8x16xf32, #tpu.memory_space<vmem>>, vector<4x8x16xf32>
      %73 = vector.broadcast %68 : vector<4x8x1xf32> to vector<4x8x16xf32>
      %74 = arith.mulf %72, %73 : vector<4x8x16xf32>
      %75 = vector.broadcast %62 : f32 to vector<4x8x16xf32>
      %76 = arith.mulf %75, %74 : vector<4x8x16xf32>
      %77 = arith.subf %71, %76 : vector<4x8x16xf32>
      %78 = arith.mulf %77, %77 : vector<4x8x16xf32>
      %cst_73 = arith.constant dense<0.000000e+00> : vector<4x8xf32>
      %79 = vector.multi_reduction <add>, %78, %cst_73 [2] : vector<4x8x16xf32> to vector<4x8xf32>
      %80 = vector.shape_cast %79 : vector<4x8xf32> to vector<4x8x1xf32>
      %cst_74 = arith.constant 1.600000e+01 : f32
      %81 = vector.broadcast %cst_74 : f32 to vector<4x8x1xf32>
      %82 = arith.divf %80, %81 : vector<4x8x1xf32>
      %cst_75 = arith.constant 9.99999997E-7 : f32
      %83 = vector.broadcast %cst_75 : f32 to vector<4x8x1xf32>
      %84 = arith.addf %82, %83 : vector<4x8x1xf32>
      %85 = math.rsqrt %84 : vector<4x8x1xf32>
      %86 = vector.broadcast %85 : vector<4x8x1xf32> to vector<4x8x16xf32>
      %87 = arith.mulf %77, %86 : vector<4x8x16xf32>
      %c0_76 = arith.constant 0 : index
      %c0_77 = arith.constant 0 : index
      %c0_78 = arith.constant 0 : index
      %88 = vector.load %arg6[%c0_76, %c0_77, %c0_78] : memref<1x1x16xf32, #tpu.memory_space<vmem>>, vector<1x1x16xf32>
      %89 = vector.broadcast %88 : vector<1x1x16xf32> to vector<4x8x16xf32>
      %90 = arith.mulf %87, %89 : vector<4x8x16xf32>
      %cst_79 = arith.constant 0.000000e+00 : f32
      %91 = vector.broadcast %cst_79 : f32 to vector<8x32xf32>
      %92 = vector.extract_strided_slice %90 {offsets = [0, 0, 0], sizes = [1, 8, 16], strides = [1, 1, 1]} : vector<4x8x16xf32> to vector<1x8x16xf32>
      %93 = vector.shape_cast %92 : vector<1x8x16xf32> to vector<8x16xf32>
      %c0_80 = arith.constant 0 : index
      %c0_81 = arith.constant 0 : index
      %c0_82 = arith.constant 0 : index
      %94 = vector.load %arg5[%c0_80, %c0_81, %c0_82] : memref<4x16x32xf32, #tpu.memory_space<vmem>>, vector<1x16x32xf32>
      %95 = vector.shape_cast %94 : vector<1x16x32xf32> to vector<16x32xf32>
      %cst_83 = arith.constant dense<0.000000e+00> : vector<8x32xf32>
      %96 = tpu.matmul %93, %95, %cst_83 {dimension_numbers = #tpu.dot_dimension_numbers<[1], [0], [0], [1], [0, 0, 1, 1], [], []>} : vector<8x16xf32>, vector<16x32xf32>, vector<8x32xf32> -> vector<8x32xf32>
      %97 = arith.addf %91, %96 : vector<8x32xf32>
      %98 = vector.extract_strided_slice %90 {offsets = [1, 0, 0], sizes = [1, 8, 16], strides = [1, 1, 1]} : vector<4x8x16xf32> to vector<1x8x16xf32>
      %99 = vector.shape_cast %98 : vector<1x8x16xf32> to vector<8x16xf32>
      %c1 = arith.constant 1 : index
      %c0_84 = arith.constant 0 : index
      %c0_85 = arith.constant 0 : index
      %100 = vector.load %arg5[%c1, %c0_84, %c0_85] : memref<4x16x32xf32, #tpu.memory_space<vmem>>, vector<1x16x32xf32>
      %101 = vector.shape_cast %100 : vector<1x16x32xf32> to vector<16x32xf32>
      %cst_86 = arith.constant dense<0.000000e+00> : vector<8x32xf32>
      %102 = tpu.matmul %99, %101, %cst_86 {dimension_numbers = #tpu.dot_dimension_numbers<[1], [0], [0], [1], [0, 0, 1, 1], [], []>} : vector<8x16xf32>, vector<16x32xf32>, vector<8x32xf32> -> vector<8x32xf32>
      %103 = arith.addf %97, %102 : vector<8x32xf32>
      %104 = vector.extract_strided_slice %90 {offsets = [2, 0, 0], sizes = [1, 8, 16], strides = [1, 1, 1]} : vector<4x8x16xf32> to vector<1x8x16xf32>
      %105 = vector.shape_cast %104 : vector<1x8x16xf32> to vector<8x16xf32>
      %c2 = arith.constant 2 : index
      %c0_87 = arith.constant 0 : index
      %c0_88 = arith.constant 0 : index
      %106 = vector.load %arg5[%c2, %c0_87, %c0_88] : memref<4x16x32xf32, #tpu.memory_space<vmem>>, vector<1x16x32xf32>
      %107 = vector.shape_cast %106 : vector<1x16x32xf32> to vector<16x32xf32>
      %cst_89 = arith.constant dense<0.000000e+00> : vector<8x32xf32>
      %108 = tpu.matmul %105, %107, %cst_89 {dimension_numbers = #tpu.dot_dimension_numbers<[1], [0], [0], [1], [0, 0, 1, 1], [], []>} : vector<8x16xf32>, vector<16x32xf32>, vector<8x32xf32> -> vector<8x32xf32>
      %109 = arith.addf %103, %108 : vector<8x32xf32>
      %110 = vector.extract_strided_slice %90 {offsets = [3, 0, 0], sizes = [1, 8, 16], strides = [1, 1, 1]} : vector<4x8x16xf32> to vector<1x8x16xf32>
      %111 = vector.shape_cast %110 : vector<1x8x16xf32> to vector<8x16xf32>
      %c3 = arith.constant 3 : index
      %c0_90 = arith.constant 0 : index
      %c0_91 = arith.constant 0 : index
      %112 = vector.load %arg5[%c3, %c0_90, %c0_91] : memref<4x16x32xf32, #tpu.memory_space<vmem>>, vector<1x16x32xf32>
      %113 = vector.shape_cast %112 : vector<1x16x32xf32> to vector<16x32xf32>
      %cst_92 = arith.constant dense<0.000000e+00> : vector<8x32xf32>
      %114 = tpu.matmul %111, %113, %cst_92 {dimension_numbers = #tpu.dot_dimension_numbers<[1], [0], [0], [1], [0, 0, 1, 1], [], []>} : vector<8x16xf32>, vector<16x32xf32>, vector<8x32xf32> -> vector<8x32xf32>
      %115 = arith.addf %109, %114 : vector<8x32xf32>
      %c0_93 = arith.constant 0 : index
      %c0_94 = arith.constant 0 : index
      %c0_95 = arith.constant 0 : index
      %116 = vector.load %arg7[%c0_93, %c0_94, %c0_95] : memref<1x8x32xf32, #tpu.memory_space<vmem>>, vector<1x8x32xf32>
      %117 = vector.shape_cast %116 : vector<1x8x32xf32> to vector<8x32xf32>
      %118 = vector.shape_cast %115 : vector<8x32xf32> to vector<1x8x32xf32>
      tpu.vector_store %arg7[%c0_93, %c0_94, %c0_95], %118 {strides = array<i32>} : memref<1x8x32xf32, #tpu.memory_space<vmem>>, vector<1x8x32xf32>,
    } else {
    }
    return
  }
  func.func @transform_0(%arg0: i32, %arg1: i32) -> (i32, i32) {
    %c0_i32 = arith.constant 0 : i32
    %c0_i32_0 = arith.constant 0 : i32
    %c0_i32_1 = arith.constant 0 : i32
    return %c0_i32, %c0_i32_0 : i32, i32
  }
  func.func @transform_1(%arg0: i32, %arg1: i32) -> (i32, i32, i32) {
    %c0_i32 = arith.constant 0 : i32
    %c0_i32_0 = arith.constant 0 : i32
    %c0_i32_1 = arith.constant 0 : i32
    return %arg0, %c0_i32, %c0_i32_0 : i32, i32, i32
  }
  func.func @transform_2(%arg0: i32, %arg1: i32) -> (i32, i32) {
    %c0_i32 = arith.constant 0 : i32
    %c0_i32_0 = arith.constant 0 : i32
    %c0_i32_1 = arith.constant 0 : i32
    return %c0_i32, %c0_i32_0 : i32, i32
  }
  func.func @transform_3(%arg0: i32, %arg1: i32) -> (i32, i32, i32) {
    %c0_i32 = arith.constant 0 : i32
    %c0_i32_0 = arith.constant 0 : i32
    %c0_i32_1 = arith.constant 0 : i32
    %c0_i32_2 = arith.constant 0 : i32
    return %c0_i32, %c0_i32_0, %c0_i32_1 : i32, i32, i32
  }
  func.func @transform_4(%arg0: i32, %arg1: i32) -> (i32, i32, i32) {
    %c0_i32 = arith.constant 0 : i32
    %c0_i32_0 = arith.constant 0 : i32
    %c0_i32_1 = arith.constant 0 : i32
    %c0_i32_2 = arith.constant 0 : i32
    return %c0_i32, %c0_i32_0, %c0_i32_1 : i32, i32, i32
  }
  func.func @transform_5(%arg0: i32, %arg1: i32) -> (i32, i32, i32) {
    %c0_i32 = arith.constant 0 : i32
    %c0_i32_0 = arith.constant 0 : i32
    %c0_i32_1 = arith.constant 0 : i32
    return %arg0, %c0_i32, %c0_i32_0 : i32, i32, i32
  }
}

</mosaic_0001>

<bundles_post_ra>
// kernel: tpu_custom_call.1
= control target key start
LH: loop header
LB: loop body
LE: loop exit
PB: predicated region body
PF: predicated region fallthrough
CT: control target
= control target key end

     0   :  { %s2587_s0 = inlined_call_operand.<no memory space> [shape: f32[1,1], index: 0, kind: input, shape index: {}]   ;;  %s2588_s1 = inlined_call_operand.hbm [shape: f32[2,8,32], index: 1, kind: input, shape index: {}]   ;;  %s2589_s2 = inlined_call_operand.hbm [shape: f32[32,192], index: 2, kind: input, shape index: {}]   ;;  %s2590_s3 = inlined_call_operand.hbm [shape: f32[4,16,32], index: 3, kind: input, shape index: {}]   ;;  %s2591_s4 = inlined_call_operand.vmem [shape: f32[1,1,16], index: 4, kind: input, shape index: {}]   ;;  %s2592_s5 = inlined_call_operand.hbm [shape: f32[2,8,32], index: 5, kind: output, shape index: {}]  }
   0x1   :  { %10 = sst [smem:[#allocation13]] %s2587_s0 }
   0x2   :  { %11 = vsyncpa [#allocation15], 0 }
   0x3   :  { %13 = vsyncpa [#allocation15 + $0x1], 0 }
   0x4   :  { %14 = vsyncpa [#allocation18], 0 }
   0x5   :  { %15 = vsyncpa [#allocation16], 0 }
   0x6   :  { %17 = vsyncpa [#allocation16 + $0x1], 0  ;;  %s2103_s20 = smov 0   ;;  %s2105_s21 = smov 0  }
   0x7   :  { %s2107_s22 = smov 0   ;;  %s2109_s23 = smov 0  }
   0x8   :  { %s2111_s24 = smov 0   ;;  %s2113_s25 = smov 0  }
   0x9 LB: > { %s1652_s0 = sadd.s32 4294967295, %s2043_s25   ;;  %p1654_p0 = scmp.ge.s32.totalorder %s2043_s25, 1  ;;  %s2043_s25 = sphi %s2113_s25, %s23_s25   ;;  %s2039_s24 = sphi %s2111_s24, %s2602_s24   ;;  %s2035_s23 = sphi %s2109_s23, %s2601_s23   ;;  %s2031_s22 = sphi %s2107_s22, %s2600_s22   ;;  %s2027_s21 = sphi %s2105_s21, %s2599_s21   ;;  %s2023_s20 = sphi %s2103_s20, %s2598_s20  }
   0xa   : > { %p2137_p1 = scmp.eq.s32.totalorder %s1652_s0, 0  ;;  %p176_p2 = scmp.lt.s32.totalorder %s2043_s25, 3 }
   0xb   : > { %s190_s29 = sshll.u32 %s2589_s2, 4  ;;  %s2045_s6 = smov [#allocation17]   ;;  %s191_s29 = int_to_ptr.hbm [resolvable:$true] %s190_s29 }
   0xc   : > { %p2145_p3 = pnand %p1654_p0, %p176_p2  ;;  %s192_s7 = sshll.u32 %s2045_s6, 4  ;;  %s193_s7 = int_to_ptr.vmem [resolvable:$true] %s192_s7 }
   0xd   : > { %p1657_p6 = scmp.ge.s32.totalorder %s2043_s25, 2  ;;  %s204_s10 = sshll.u32 %s2590_s3, 4  ;;  %s205_s10 = int_to_ptr.hbm [resolvable:$true] %s204_s10 }
   0xe   : > { %p1711_p4 = pneg %p2145_p3  ;;  %s2046_s11 = smov 256  }
   0xf   : > { %s2047_s12 = smov 16   ;;  %s2048_s13 = smov [#allocation19]  }
  0x10   : > { %p1712_p5 = pnand %p1711_p4, %p2137_p1  ;;  %s206_s14 = sshll.u32 %s2048_s13, 4  ;;  %s207_s14 = int_to_ptr.vmem [resolvable:$true] %s206_s14 }
  0x11   : > { %s2049_s15 = smov 128   ;;  %s2050_s16 = smov 8  }
  0x12   : > { %1714 = dma.hbm_to_vmem [thread:$0]  (!%p1712_p5), %s191_s29, 1024, %s193_s7, [#allocation18], %s2046_s11, %s2046_s11, %s2047_s12  }
  0x13   : > { %1717 = dma.hbm_to_vmem [thread:$0]  (!%p1712_p5), %s205_s10, 1024, %s207_s14, [#allocation18], %s2049_s15, %s2049_s15, %s2050_s16  }
  0x14   : > { %s35_s17 = sadd.s32 1, %s2039_s24  ;;  %s1653_s18 = sadd.s32 4294967294, %s2043_s25  }
  0x15   : > { %p37_p7 = scmp.ge.s32.totalorder %s35_s17, 2  ;;  %s63_s19 = sadd.s32 1, %s2031_s22 }
  0x16   : > { %p70_p8 = scmp.ne.s32.totalorder %s2031_s22, %s2027_s21  ;;  %p71_p9 = scmp.eq.s32.totalorder %s2043_s25, 0 }
  0x17   : > { %s2604_s17 = smov (%p37_p7, %s35_s17), 0  ;;  %p76_p10 = scmp.ne.s32.totalorder %s2027_s21, %s2023_s20 }
  0x18   : > { %s60_s27 = ssub.s32 %s2039_s24, %s2604_s17  ;;  %p163_p11 = scmp.eq.s32.totalorder %s1652_s0, 1 }
  0x19   : > { %p61_p12 = scmp.eq.s32.totalorder %s60_s27, 0  ;;  %p2173_p13 = por %p2137_p1, %p76_p10 }
  0x1a   : > { %p2177_p0 = por %p163_p11, %p70_p8  ;;  %p169_p2 = scmp.eq.s32.totalorder %s1653_s18, 1 }
  0x1b   : > { %s2182_s6 = scalar_select %p61_p12, %s2031_s22, %s63_s19  }
  0x1c   : > { %p72_p4 = por %p71_p9, %p70_p8  ;;  %p2184_p5 = por %p169_p2, %p76_p10 }
  0x1d   : > { %s223_s8 = sand.u32 1, %s2031_s22   ;;  %s1659_s0 = sshll.u32 %s2039_s24, 3 }
  0x1e   : > { %p1728_p7 = scmp.lt.s32.totalorder %s2043_s25, 2  ;;  %s1658_s9 = sshll.u32 %s223_s8, 3 }
  0x1f   : > { %s231_s12 = scalar_lea.hbm %s2588_s1, %s1659_s0  ;;  %s227_s14 = scalar_lea.vmem [#allocation14], %s1658_s9 }
  0x20   : > { %s233_s13 = sshll.u32 %s231_s12, 4  ;;  %s235_s15 = sshll.u32 %s227_s14, 4  ;;  %s234_s13 = int_to_ptr.hbm [resolvable:$true] %s233_s13  ;;  %s236_s15 = int_to_ptr.vmem [resolvable:$true] %s235_s15 }
  0x21   : > { %p1719_p11 = pnand %p1728_p7, %p72_p4  ;;  %s224_s16 = scalar_lea.sflag [#allocation15], %s223_s8 }
  0x22   : > { %244 = sbr.rel (%p2145_p3) target bundleno = 1290 (0x50a), region = 40  ;;  %s2197_s18 = sand.u32 (!%p2145_p3), 1, %s2027_s21  }
  0x23   : > { %1721 = dma.hbm_to_vmem [thread:$0]  (!%p1719_p11), %s234_s13, 128, %s236_s15, %s224_s16  }
  0x24   : > { %s1661_s19 = sshll.u32 (!%p2145_p3), %s2197_s18, 3  ;;  %s247_s27 = scalar_lea.sflag (!%p2145_p3), [#allocation15], %s2197_s18 }
  0x25   : > { %s250_s0 = scalar_lea.vmem (!%p2145_p3), [#allocation14], %s1661_s19 }
  0x27   : > { %2010 = dma.done.wait (%p2173_p13), %s247_s27, 128  }
  0x28   : > { %2012 = vsyncadd (%p2173_p13), %s247_s27, 4294967168 }
  0x29   : > { %2014 = dma.done.wait (%p2137_p1), [#allocation18], 2048  }
  0x2a   : > { %2016 = vsyncadd (%p2137_p1), [#allocation18], 4294965248  ;;  %v299_v0 = vld [vmem:[#allocation17 + $0x30] sm:$0xff]  ;;  %v297_v1 = vld [vmem:[#allocation17 + $0x20] sm:$0xff]  ;;  %vm301_vm0 = vcmask 261120   ;;  %vm345_vm1 = vcmask 64512  }
  0x2b   : > { %317 = vmatpush.msra.mxu0 %v299_v0  ;;  %v295_v2 = vld [vmem:[#allocation17 + $0x10] sm:$0xff]  ;;  %v293_v3 = vld [vmem:[#allocation17] sm:$0xff]  ;;  %s2051_s30 = smov 40   ;;  %s2052_s28 = smov 120   ;;  %v300_v9 = vld [vmem:[#allocation17 + $0x38] sm:$0xff]  ;;  %vm360_vm2 = vcmask 130048  }
  0x2c   : > { %v292_v4 = vld [vmem:[%s250_s0] sm:$0xff]  ;;  %s2053_s26 = smov 64   ;;  %s2054_s8 = smov 112   ;;  %v298_v10 = vld [vmem:[#allocation17 + $0x28] sm:$0xff]  ;;  %337 = vmatpush.msra.mxu1 %v300_v9  ;;  %vm438_vm3 = vcmask 7168   ;;  %v2066_v57 = vmov -inf  }
  0x2d   : > { %318 = vmatpush.msra.mxu0 %v297_v1  ;;  %s2055_s9 = smov 48   ;;  %s2056_s10 = smov 56   ;;  %v296_v14 = vld [vmem:[#allocation17 + $0x18] sm:$0xff]  ;;  %v294_v15 = vld [vmem:[#allocation17 + $0x8] sm:$0xff]  ;;  %440 = vst.msk [vmem:[#allocation7 + $0x8] sm:$0xff] %vm438_vm3, %v2066_v57  ;;  %v2067_v60 = vmov 0  }
  0x2e   : > { %s2057_s11 = smov 8   ;;  %s2058_s12 = smov 16   ;;  %338 = vmatpush.msra.mxu1 %v298_v10  ;;  %439 = vst.msk [vmem:[#allocation7] sm:$0xff] %vm438_vm3, %v2066_v57  ;;  %1807 = vset.pattern.permute.xlu2 %v2067_v60  ;;  %v2068_v61 = vmov 0.0  }
  0x2f   : > { %319 = vmatpush.msra.mxu0 %v295_v2  ;;  %s2059_s13 = smov 104   ;;  %s2060_s14 = smov 32   ;;  %441 = vst.msk [vmem:[#allocation7 + $0x10] sm:$0xff] %vm438_vm3, %v2066_v57  ;;  %1806 = vset.pattern.permute.xlu0 %v2067_v60 }
  0x30   : > { %s2061_s15 = smov 72   ;;  %s2062_s16 = smov 80   ;;  %339 = vmatpush.msra.mxu1 %v296_v14  ;;  %442 = vst.msk [vmem:[#allocation7 + $0x18] sm:$0xff] %vm438_vm3, %v2066_v57  ;;  %1805 = vset.pattern.permute.xlu1 %v2067_v60 }
  0x31   : > { %320 = vmatpush.msra.mxu0 %v293_v3  ;;  %s2063_s27 = smov 88   ;;  %s2064_s0 = smov 96   ;;  %443 = vst.msk [vmem:[#allocation10] sm:$0xff] %vm438_vm3, %v2066_v57 }
  0x32   : > { %1665 = vmatmul.msk.f32.vlgmr.msra.gmra.mxu0 %vm301_vm0, %v292_v4  ;;  %340 = vmatpush.msra.mxu1 %v294_v15  ;;  %444 = vst.msk [vmem:[#allocation10 + $0x8] sm:$0xff] %vm438_vm3, %v2066_v57 }
  0x33   : > { %1666 = vmatmul.msk.f32.vlgmr.msra.gmra.mxu1 %vm301_vm0, %v292_v4  ;;  %445 = vst.msk [vmem:[#allocation10 + $0x10] sm:$0xff] %vm438_vm3, %v2066_v57 }
  0x34   : > { %446 = vst.msk [vmem:[#allocation10 + $0x18] sm:$0xff] %vm438_vm3, %v2066_v57  ;;  %v2310_v62 = vld [vmem:[#allocation7 + $0x8] sm:$0xff] }
  0x35   : > { %461 = vst.msk [vmem:[#allocation12 + $0x10] sm:$0xff] %vm360_vm2, %v2068_v61 }
  0x36   : > { %447 = vst.msk [vmem:[#allocation8] sm:$0xff] %vm438_vm3, %v2068_v61  ;;  %v2322_v3 = vld [vmem:[#allocation7 + $0x10] sm:$0xff] }
  0x37   : > { %448 = vst.msk [vmem:[#allocation8 + $0x8] sm:$0xff] %vm438_vm3, %v2068_v61  ;;  %v2320_v2 = vld [vmem:[#allocation7 + $0x18] sm:$0xff] }
  0x38   : > { %449 = vst.msk [vmem:[#allocation8 + $0x10] sm:$0xff] %vm438_vm3, %v2068_v61  ;;  %v2338_v10 = vld [vmem:[#allocation10] sm:$0xff] }
  0x39   : > { %450 = vst.msk [vmem:[#allocation8 + $0x18] sm:$0xff] %vm438_vm3, %v2068_v61  ;;  %v2347_v14 = vld [vmem:[#allocation10 + $0x8] sm:$0xff] }
  0x3a   : > { %451 = vst.msk [vmem:[#allocation11] sm:$0xff] %vm438_vm3, %v2068_v61 }
  0x3b   : > { %452 = vst.msk [vmem:[#allocation11 + $0x8] sm:$0xff] %vm438_vm3, %v2068_v61 }
  0x3c   : > { %453 = vst.msk [vmem:[#allocation11 + $0x10] sm:$0xff] %vm438_vm3, %v2068_v61 }
  0x3d   : > { %454 = vst.msk [vmem:[#allocation11 + $0x18] sm:$0xff] %vm438_vm3, %v2068_v61 }
  0x3e   : > { %455 = vst.msk [vmem:[#allocation9] sm:$0xff] %vm360_vm2, %v2068_v61 }
  0x3f   : > { %456 = vst.msk [vmem:[#allocation9 + $0x8] sm:$0xff] %vm360_vm2, %v2068_v61 }
  0x40   : > { %457 = vst.msk [vmem:[#allocation9 + $0x10] sm:$0xff] %vm360_vm2, %v2068_v61 }
  0x41   : > { %458 = vst.msk [vmem:[#allocation9 + $0x18] sm:$0xff] %vm360_vm2, %v2068_v61 }
  0x42   : > { %459 = vst.msk [vmem:[#allocation12] sm:$0xff] %vm360_vm2, %v2068_v61 }
  0x43   : > { %460 = vst.msk [vmem:[#allocation12 + $0x8] sm:$0xff] %vm360_vm2, %v2068_v61 }
  0x44   : > { %462 = vst.msk [vmem:[#allocation12 + $0x18] sm:$0xff] %vm360_vm2, %v2068_v61 }
  0xaf   : > { %v322_v5 = vpop.f32.mrf.mxu0 }
  0xb0   : > { %423 = vrot.lane.b32.xlu2 %v322_v5, %s2051_s30  ;;  %362 = vrot.lane.b32.xlu1 %v322_v5, %s2052_s28  ;;  %346 = vst.msk [vmem:[#allocation2] sm:$0xff] %vm345_vm1, %v322_v5  ;;  %s2065_s30 = smov 24   ;;  %v2248_v41 = vpop.f32.mrf.mxu1  ;;  %s1149_s28 = sld [smem:[#allocation13]] }
  0xb1   : > { %352 = vrot.lane.b32.xlu0 %v322_v5, %s2053_s26  ;;  %361 = vst.msk [vmem:[#allocation6] sm:$0xff] %vm360_vm2, %v2248_v41 }
  0xb7   : > { %v464_v21 = vld [vmem:[#allocation2] sm:$0xff] }
  0xb8   : > { %388 = vrot.lane.b32.xlu2 %v322_v5, %s2054_s8  ;;  %398 = vrot.lane.b32.xlu1 %v322_v5, %s2055_s9  ;;  %v483_v42 = vld [vmem:[#allocation6] sm:$0xff]  ;;  %s1696_s9 = sshll.u32 %s2035_s23, 3  ;;  %s1534_s23 = scalar_lea.sflag [#allocation16], %s2197_s18 }
  0xb9   : > { %372 = vrot.lane.b32.xlu0 %v322_v5, %s2056_s10 }
  0xc0   : > { %428 = vrot.lane.b32.xlu2 %v322_v5, %s2057_s11  ;;  %403 = vrot.lane.b32.xlu1 %v322_v5, %s2058_s12  ;;  %s1544_s12 = scalar_lea.hbm %s2592_s5, %s1696_s9 }
  0xc1   : > { %413 = vrot.lane.b32.xlu0 %v322_v5, %s2059_s13  ;;  %s287_s13 = scalar_lea.vmem [#allocation20], %s1661_s19  ;;  %s1977_s19 = scalar_lea.hbm %s2592_s5, 16 }
  0xc8   : > { %356 = vrot.lane.b32.xlu2 %v322_v5, %s2060_s14  ;;  %418 = vrot.lane.b32.xlu1 %v322_v5, %s2061_s15  ;;  %s1546_s14 = sshll.u32 %s287_s13, 4  ;;  %s1548_s15 = sshll.u32 %s1544_s12, 4  ;;  %s1547_s14 = int_to_ptr.vmem [resolvable:$true] %s1546_s14  ;;  %s1549_s15 = int_to_ptr.hbm [resolvable:$true] %s1548_s15 }
  0xc9   : > { %393 = vrot.lane.b32.xlu0 %v322_v5, %s2062_s16 }
  0xd0   : > { %367 = vrot.lane.b32.xlu2 %v322_v5, %s2063_s27  ;;  %348 = vrot.lane.b32.xlu1 %v322_v5, %s2064_s0 }
  0xd1   : > { %377 = vrot.lane.b32.xlu0 %v322_v5, %s2065_s30 }
 0x10a   : > { %v424_v6 = vpop.permute.xlu2 %423 }
 0x10b   : > { %427 = vst.msk [vmem:[#allocation4 + $0x18] sm:$0xff] %vm345_vm1, %v424_v6 }
 0x112   : > { %v389_v7 = vpop.permute.xlu2 %388  ;;  %v476_v26 = vld [vmem:[#allocation4 + $0x18] sm:$0xff] }
 0x113   : > { %392 = vst.msk [vmem:[#allocation2 + $0x10] sm:$0xff] %vm345_vm1, %v389_v7 }
 0x11a   : > { %v429_v8 = vpop.permute.xlu2 %428  ;;  %v466_v28 = vld [vmem:[#allocation2 + $0x10] sm:$0xff] }
 0x11b   : > { %432 = vst.msk [vmem:[#allocation5 + $0x18] sm:$0xff] %vm345_vm1, %v429_v8 }
 0x122   : > { %v357_v11 = vpop.permute.xlu2 %356  ;;  %v363_v12 = vpop.permute.xlu1 %362  ;;  %v481_v29 = vld [vmem:[#allocation5 + $0x18] sm:$0xff] }
 0x123   : > { %359 = vst.msk [vmem:[#allocation5] sm:$0xff] %vm345_vm1, %v357_v11  ;;  %v353_v13 = vpop.permute.xlu0 %352 }
 0x124   : > { %366 = vst.msk [vmem:[#allocation2 + $0x8] sm:$0xff] %vm345_vm1, %v363_v12 }
 0x125   : > { %355 = vst.msk [vmem:[#allocation4] sm:$0xff] %vm345_vm1, %v353_v13  ;;  %v2345_v13 = vld [vmem:[#allocation10 + $0x18] sm:$0xff] }
 0x12a   : > { %v368_v16 = vpop.permute.xlu2 %367  ;;  %v399_v17 = vpop.permute.xlu1 %398  ;;  %v478_v18 = vld [vmem:[#allocation5] sm:$0xff] }
 0x12b   : > { %371 = vst.msk [vmem:[#allocation3 + $0x8] sm:$0xff] %vm345_vm1, %v368_v16  ;;  %v373_v19 = vpop.permute.xlu0 %372  ;;  %1675 = vmatpush.xpose.msk.msrb.mxu0 %vm345_vm1, %v478_v18  ;;  %v465_v27 = vld [vmem:[#allocation2 + $0x8] sm:$0xff] }
 0x12c   : > { %402 = vst.msk [vmem:[#allocation4 + $0x10] sm:$0xff] %vm345_vm1, %v399_v17  ;;  %v473_v20 = vld [vmem:[#allocation4] sm:$0xff] }
 0x12d   : > { %376 = vst.msk [vmem:[#allocation4 + $0x8] sm:$0xff] %vm345_vm1, %v373_v19  ;;  %1667 = vmatpush.xpose.msk.msra.mxu2 %vm345_vm1, %v473_v20 }
 0x12f   : > { %835 = vmatpush.msra.mxu0 %v483_v42 }
 0x130   : > { %1668 = vmatmul.msk.f32.vlgmr.msra.gmra.mxu2 %vm345_vm1, %v464_v21  ;;  %v2366_v21 = vld [vmem:[#allocation7] sm:$0xff] }
 0x132   : > { %v404_v22 = vpop.permute.xlu1 %403  ;;  %v469_v40 = vld [vmem:[#allocation3 + $0x8] sm:$0xff] }
 0x133   : > { %407 = vst.msk [vmem:[#allocation5 + $0x10] sm:$0xff] %vm345_vm1, %v404_v22  ;;  %v414_v23 = vpop.permute.xlu0 %413  ;;  %v475_v24 = vld [vmem:[#allocation4 + $0x10] sm:$0xff] }
 0x134   : > { %417 = vst.msk [vmem:[#allocation2 + $0x18] sm:$0xff] %vm345_vm1, %v414_v23  ;;  %v474_v25 = vld [vmem:[#allocation4 + $0x8] sm:$0xff]  ;;  %1671 = vmatpush.xpose.msk.msrb.mxu2 %vm345_vm1, %v475_v24 }
 0x135   : > { %1669 = vmatpush.xpose.msk.msra.mxu3 %vm345_vm1, %v474_v25 }
 0x138   : > { %1670 = vmatmul.msk.f32.vlgmr.msra.gmra.mxu3 %vm345_vm1, %v465_v27  ;;  %1672 = vmatmul.msk.f32.vlgmr.msrb.gmra.mxu2 %vm345_vm1, %v466_v28  ;;  %v924_v28 = vld [vmem:[#allocation10 + $0x10] sm:$0xff] }
 0x139   : > { %1673 = vmatpush.xpose.msk.msrb.mxu3 %vm345_vm1, %v476_v26 }
 0x13a   : > { %v419_v30 = vpop.permute.xlu1 %418  ;;  %v480_v31 = vld [vmem:[#allocation5 + $0x10] sm:$0xff] }
 0x13b   : > { %422 = vst.msk [vmem:[#allocation3 + $0x18] sm:$0xff] %vm345_vm1, %v419_v30  ;;  %v394_v32 = vpop.permute.xlu0 %393  ;;  %1679 = vmatpush.xpose.msk.msra.mxu2 %vm345_vm1, %v480_v31  ;;  %v467_v33 = vld [vmem:[#allocation2 + $0x18] sm:$0xff] }
 0x13c   : > { %397 = vst.msk [vmem:[#allocation3 + $0x10] sm:$0xff] %vm345_vm1, %v394_v32 }
 0x13d   : > { %1681 = vmatpush.xpose.msk.msra.mxu3 %vm345_vm1, %v481_v29 }
 0x140   : > { %1674 = vmatmul.msk.f32.vlgmr.msrb.gmra.mxu3 %vm345_vm1, %v467_v33 }
 0x142   : > { %v349_v34 = vpop.permute.xlu1 %348  ;;  %v471_v37 = vld [vmem:[#allocation3 + $0x18] sm:$0xff] }
 0x143   : > { %351 = vst.msk [vmem:[#allocation3] sm:$0xff] %vm345_vm1, %v349_v34  ;;  %v378_v35 = vpop.permute.xlu0 %377  ;;  %v470_v36 = vld [vmem:[#allocation3 + $0x10] sm:$0xff] }
 0x144   : > { %381 = vst.msk [vmem:[#allocation5 + $0x8] sm:$0xff] %vm345_vm1, %v378_v35  ;;  %1680 = vmatmul.msk.f32.vlgmr.msra.gmra.mxu2 %vm345_vm1, %v470_v36 }
 0x148   : > { %1682 = vmatmul.msk.f32.vlgmr.msra.gmra.mxu3 %vm345_vm1, %v471_v37 }
 0x14a   : > { %v468_v38 = vld [vmem:[#allocation3] sm:$0xff] }
 0x14b   : > { %1676 = vmatmul.msk.f32.vlgmr.msrb.gmra.mxu0 %vm345_vm1, %v468_v38  ;;  %v479_v39 = vld [vmem:[#allocation5 + $0x8] sm:$0xff] }
 0x14c   : > { %1677 = vmatpush.xpose.msk.msrb.mxu1 %vm345_vm1, %v479_v39  ;;  %1060 = vmatpush.msrb.mxu0 %v483_v42 }
 0x14f   : > { %1678 = vmatmul.msk.f32.vlgmr.msrb.gmra.mxu1 %vm345_vm1, %v469_v40 }
 0x1b3   : > { %v2252_v43 = vpop.f32.mrf.mxu2 }
 0x1b4   : > { %v700_v56 = vsel %vm345_vm1, %v2252_v43, -inf }
 0x1bb   : > { %v2254_v44 = vpop.f32.mrf.mxu3  ;;  %v2258_v46 = vpop.f32.mrf.mxu2 }
 0x1bc   : > { %v703_v45 = vsel %vm345_vm1, %v2254_v44, -inf  ;;  %v706_v49 = vsel %vm345_vm1, %v2258_v46, -inf }
 0x1bd   : > { %704 = vmax.xlane.f32.xlu0 %v703_v45 }
 0x1c3   : > { %v2260_v47 = vpop.f32.mrf.mxu3 }
 0x1c4   : > { %v709_v48 = vsel %vm345_vm1, %v2260_v47, -inf }
 0x1c5   : > { %710 = vmax.xlane.f32.xlu1 %v709_v48  ;;  %707 = vmax.xlane.f32.xlu0 %v706_v49 }
 0x1c7   : > { %v2290_v58 = vpop.f32.mrf.mxu2 }
 0x1c8   : > { %v2266_v50 = vpop.f32.mrf.mxu0  ;;  %v932_v59 = vsel %vm345_vm1, %v2290_v58, -inf }
 0x1c9   : > { %v926_v51 = vsel %vm345_vm1, %v2266_v50, -inf }
 0x1ca   : > { %927 = vmax.xlane.f32.xlu2 %v926_v51 }
 0x1cb   : > { %v2270_v52 = vpop.f32.mrf.mxu3 }
 0x1cc   : > { %v935_v53 = vsel %vm345_vm1, %v2270_v52, -inf  ;;  %v2274_v54 = vpop.f32.mrf.mxu1 }
 0x1cd   : > { %936 = vmax.xlane.f32.xlu1 %v935_v53  ;;  %v929_v55 = vsel %vm345_vm1, %v2274_v54, -inf }
 0x1ce   : > { %930 = vmax.xlane.f32.xlu0 %v929_v55 }
 0x1d2   : > { %701 = vmax.xlane.f32.xlu2 %v700_v56 }
 0x1ea   : > { %408 = vrot.lane.b32.xlu2 %v2248_v41, %s2064_s0 }
 0x213   : > { %933 = vmax.xlane.f32.xlu2 %v932_v59 }
 0x230   : > { %v705_v63 = vpop.xlane.xlu0 %704 }
 0x231   : > { %v2313_v0 = vmax.f32 %v2310_v62, %v705_v63 }
 0x233   : > { %v717_v1 = vsub.f32 %v2310_v62, %v2313_v0  ;;  %919 = vst.msk [vmem:[#allocation7 + $0x8] sm:$0xff] %vm438_vm3, %v2313_v0  ;;  %735 = vperm.xlu2 %1807, %v2313_v0  }
 0x238   : > { %v711_v4 = vpop.xlane.xlu1 %710  ;;  %v708_v5 = vpop.xlane.xlu0 %707 }
 0x239   : > { %v2325_v6 = vmax.f32 %v2320_v2, %v711_v4  ;;  %v2328_v7 = vmax.f32 %v2322_v3, %v708_v5 }
 0x23b   : > { %v719_v8 = vsub.f32 %v2320_v2, %v2325_v6  ;;  %921 = vst.msk [vmem:[#allocation7 + $0x18] sm:$0xff] %vm438_vm3, %v2325_v6  ;;  %v718_v9 = vsub.f32 %v2322_v3, %v2328_v7  ;;  %745 = vperm.xlu0 %1806, %v2325_v6   ;;  %740 = vperm.xlu1 %1805, %v2328_v7   ;;  %v761_v3 = vld [vmem:[#allocation8 + $0x8] sm:$0xff] }
 0x23c   : > { %920 = vst.msk [vmem:[#allocation7 + $0x10] sm:$0xff] %vm438_vm3, %v2328_v7  ;;  %v760_v7 = vld [vmem:[#allocation8] sm:$0xff] }
 0x23d   : > { %v928_v11 = vpop.xlane.xlu2 %927  ;;  %v724_v2 = vmul.f32 1.442695, %v718_v9 }
 0x23e   : > { %v2343_v12 = vmax.f32 %v2338_v10, %v928_v11 }
 0x240   : > { %v942_v15 = vsub.f32 %v2338_v10, %v2343_v12  ;;  %1142 = vst.msk [vmem:[#allocation10] sm:$0xff] %vm438_vm3, %v2343_v12  ;;  %v937_v16 = vpop.xlane.xlu1 %936 }
 0x241   : > { %v2354_v17 = vmax.f32 %v2345_v13, %v937_v16  ;;  %v931_v18 = vpop.xlane.xlu0 %930 }
 0x242   : > { %v2357_v19 = vmax.f32 %v2347_v14, %v931_v18 }
 0x243   : > { %v945_v20 = vsub.f32 %v2345_v13, %v2354_v17  ;;  %1145 = vst.msk [vmem:[#allocation10 + $0x18] sm:$0xff] %vm438_vm3, %v2354_v17  ;;  %956 = vperm.xlu0 %1806, %v2343_v12   ;;  %433 = vrot.lane.b32.xlu1 %v2248_v41, %s2062_s16  ;;  %v722_v13 = vmul.f32 1.442695, %v717_v1  ;;  %v726_v12 = vmul.f32 1.442695, %v719_v8  ;;  %s1971_s16 = sshra.s32 %s1549_s15, 4  ;;  %s1972_s16 = int_to_ptr.hbm [resolvable:$true] %s1971_s16 }
 0x244   : > { %v943_v22 = vsub.f32 %v2347_v14, %v2357_v19  ;;  %1143 = vst.msk [vmem:[#allocation10 + $0x8] sm:$0xff] %vm438_vm3, %v2357_v19  ;;  %s1973_s27 = scalar_lea.hbm %s1972_s16, 8  ;;  %p1978_p9 = scmp.lt.s32.totalorder %s1972_s16, %s2592_s5 }
 0x245   : > { %v702_v23 = vpop.xlane.xlu2 %701  ;;  %p1974_p1 = scmp.ne.s32.totalorder %s1972_s16, %s1973_s27  ;;  %p1979_p10 = scmp.lt.s32.totalorder %s1977_s19, %s1973_s27 }
 0x246   : > { %v2373_v24 = vmax.f32 %v2366_v21, %v702_v23  ;;  %v948_v8 = vmul.f32 1.442695, %v943_v22  ;;  %v762_v22 = vld [vmem:[#allocation8 + $0x10] sm:$0xff] }
 0x247   : > { %p1975_p3 = pnand %p1974_p1, %p2177_p0  ;;  %p1980_p12 = por %p1979_p10, %p1978_p9 }
 0x248   : > { %v716_v25 = vsub.f32 %v2366_v21, %v2373_v24  ;;  %918 = vst.msk [vmem:[#allocation7] sm:$0xff] %vm438_vm3, %v2373_v24 }
 0x249   : > { %p1976_p8 = pneg %p1975_p3 }
 0x24a   : > { %v720_v0 = vmul.f32 1.442695, %v716_v25 }
 0x24b   : > { %730 = vperm.xlu1 %1805, %v2373_v24   ;;  %v986_v24 = vld [vmem:[#allocation11] sm:$0xff]  ;;  %p1981_p13 = pnand %p1980_p12, %p1976_p8 }
 0x24d   : > { %v409_v26 = vpop.permute.xlu2 %408 }
 0x24e   : > { %412 = vst.msk [vmem:[#allocation6 + $0x10] sm:$0xff] %vm360_vm2, %v409_v26 }
 0x253   : > { %971 = vperm.xlu1 %1805, %v2354_v17  }
 0x255   : > { %v485_v27 = vld [vmem:[#allocation6 + $0x10] sm:$0xff] }
 0x256   : > { %881 = vmatpush.msrb.mxu2 %v485_v27 }
 0x258   : > { %1106 = vmatpush.msra.mxu2 %v485_v27 }
 0x25b   : > { %961 = vperm.xlu1 %1805, %v2357_v19  }
 0x286   : > { %v934_v29 = vpop.xlane.xlu2 %933 }
 0x287   : > { %v940_v30 = vmax.f32 %v924_v28, %v934_v29 }
 0x289   : > { %v944_v31 = vsub.f32 %v924_v28, %v940_v30  ;;  %1144 = vst.msk [vmem:[#allocation10 + $0x10] sm:$0xff] %vm438_vm3, %v940_v30  ;;  %966 = vperm.xlu2 %1807, %v940_v30   ;;  %v946_v30 = vmul.f32 1.442695, %v942_v15 }
 0x28b   : > { %v950_v32 = vmul.f32 1.442695, %v944_v31 }
 0x28d   : > { %1809 = vpow2.f32 %v950_v32 }
 0x28e   : > { %v736_v39 = vpop.permute.xlu2 %735 }
 0x28f   : > { %v749_v49 = vsub.f32 %v2254_v44, %v736_v39 }
 0x291   : > { %383 = vrot.lane.b32.xlu2 %v2248_v41, %s2054_s8 }
 0x293   : > { %v2386_v33 = vpop.eup %1809 }
 0x294   : > { %1030 = vperm.xlu1 %1805, %v2386_v33  }
 0x2ad   : > { %v741_v34 = vpop.permute.xlu1 %740  ;;  %v746_v35 = vpop.permute.xlu0 %745 }
 0x2ae   : > { %v750_v36 = vsub.f32 %v2258_v46, %v741_v34  ;;  %v751_v38 = vsub.f32 %v2260_v47, %v746_v35  ;;  %v754_v46 = vmul.f32 1.442695, %v749_v49 }
 0x2b0   : > { %v756_v37 = vmul.f32 1.442695, %v750_v36  ;;  %v758_v40 = vmul.f32 1.442695, %v751_v38 }
 0x2b2   : > { %1811 = vpow2.f32 %v756_v37 }
 0x2b3   : > { %1813 = vpow2.f32 %v758_v40 }
 0x2b5   : > { %v434_v42 = vpop.permute.xlu1 %433  ;;  %v957_v45 = vpop.permute.xlu0 %956 }
 0x2b6   : > { %437 = vst.msk [vmem:[#allocation6 + $0x18] sm:$0xff] %vm360_vm2, %v434_v42  ;;  %v974_v41 = vsub.f32 %v2266_v50, %v957_v45 }
 0x2b8   : > { %v1812_v48 = vpop.eup %1811  ;;  %v978_v51 = vmul.f32 1.442695, %v974_v41  ;;  %v763_v41 = vld [vmem:[#allocation8 + $0x18] sm:$0xff] }
 0x2b9   : > { %1685 = vmatmul.msk.f32.vlgmr.msrb.gmra.mxu2 %vm345_vm1, %v1812_v48  ;;  %v1814_v55 = vpop.eup %1813  ;;  %v774_v26 = vsel %vm345_vm1, %v1812_v48, 0.0 }
 0x2ba   : > { %1815 = vpow2.f32 %v978_v51 }
 0x2bb   : > { %1817 = vpow2.f32 %v754_v46 }
 0x2bd   : > { %v731_v53 = vpop.permute.xlu1 %730  ;;  %v486_v47 = vld [vmem:[#allocation6 + $0x18] sm:$0xff] }
 0x2be   : > { %v748_v56 = vsub.f32 %v2252_v43, %v731_v53  ;;  %904 = vmatpush.msrb.mxu3 %v486_v47 }
 0x2bf   : > { %1686 = vmatmul.msk.f32.vlgmr.msrb.gmra.mxu3 %vm345_vm1, %v1814_v55 }
 0x2c0   : > { %v1816_v57 = vpop.eup %1815  ;;  %v752_v50 = vmul.f32 1.442695, %v748_v56  ;;  %1129 = vmatpush.msra.mxu3 %v486_v47 }
 0x2c1   : > { %v994_v44 = vsel %vm345_vm1, %v1816_v57, 0.0  ;;  %v1818_v60 = vpop.eup %1817 }
 0x2c2   : > { %1819 = vpow2.f32 %v752_v50  ;;  %995 = vadd.xlane.f32.xlu0 %v994_v44  ;;  %v771_v5 = vsel %vm345_vm1, %v1818_v60, 0.0  ;;  %v987_v50 = vld [vmem:[#allocation11 + $0x8] sm:$0xff] }
 0x2c5   : > { %v972_v59 = vpop.permute.xlu1 %971 }
 0x2c6   : > { %v977_v61 = vsub.f32 %v2270_v52, %v972_v59  ;;  %v777_v52 = vsel %vm345_vm1, %v1814_v55, 0.0 }
 0x2c8   : > { %v1820_v63 = vpop.eup %1819  ;;  %v984_v4 = vmul.f32 1.442695, %v977_v61 }
 0x2c9   : > { %1683 = vmatmul.msk.f32.vlgmr.msra.gmra.mxu0 %vm345_vm1, %v1820_v63  ;;  %v768_v43 = vsel %vm345_vm1, %v1820_v63, 0.0 }
 0x2ca   : > { %1821 = vpow2.f32 %v984_v4  ;;  %769 = vadd.xlane.f32.xlu2 %v768_v43  ;;  %772 = vadd.xlane.f32.xlu0 %v771_v5 }
 0x2cd   : > { %v962_v11 = vpop.permute.xlu1 %961 }
 0x2ce   : > { %v975_v16 = vsub.f32 %v2274_v54, %v962_v11  ;;  %v952_v54 = vmul.f32 1.442695, %v945_v20 }
 0x2d0   : > { %v1822_v18 = vpop.eup %1821  ;;  %v980_v23 = vmul.f32 1.442695, %v975_v16 }
 0x2d1   : > { %1687 = vmatmul.msk.f32.vlgmr.msrb.gmra.mxu0 %vm345_vm1, %v1816_v57  ;;  %1690 = vmatmul.msk.f32.vlgmr.msra.gmra.mxu3 %vm345_vm1, %v1822_v18  ;;  %v1003_v29 = vsel %vm345_vm1, %v1822_v18, 0.0 }
 0x2d2   : > { %1823 = vpow2.f32 %v980_v23  ;;  %778 = vadd.xlane.f32.xlu2 %v777_v52  ;;  %775 = vadd.xlane.f32.xlu0 %v774_v26 }
 0x2d3   : > { %1825 = vpow2.f32 %v952_v54 }
 0x2d4   : > { %1827 = vpow2.f32 %v946_v30 }
 0x2d8   : > { %v1824_v27 = vpop.eup %1823 }
 0x2d9   : > { %v997_v28 = vsel %vm345_vm1, %v1824_v27, 0.0  ;;  %v2416_v34 = vpop.eup %1825 }
 0x2da   : > { %998 = vadd.xlane.f32.xlu1 %v997_v28  ;;  %v1828_v20 = vpop.eup %1827 }
 0x2db   : > { %v990_v25 = vmul.f32 %v1828_v20, %v986_v24 }
 0x2e2   : > { %1004 = vadd.xlane.f32.xlu1 %v1003_v29 }
 0x2e3   : > { %v967_v31 = vpop.permute.xlu2 %966 }
 0x2e4   : > { %v976_v32 = vsub.f32 %v2290_v58, %v967_v31 }
 0x2e6   : > { %v982_v35 = vmul.f32 1.442695, %v976_v32  ;;  %1035 = vperm.xlu0 %1806, %v2416_v34  }
 0x2e8   : > { %1829 = vpow2.f32 %v982_v35 }
 0x2e9   : > { %1831 = vpow2.f32 %v722_v13  ;;  %v1017_v13 = vld [vmem:[#allocation12 + $0x18] sm:$0xff] }
 0x2ea   : > { %1833 = vpow2.f32 %v726_v12 }
 0x2eb   : > { %v384_v17 = vpop.permute.xlu2 %383  ;;  %1835 = vpow2.f32 %v720_v0 }
 0x2ec   : > { %387 = vst.msk [vmem:[#allocation6 + $0x8] sm:$0xff] %vm360_vm2, %v384_v17  ;;  %1837 = vpow2.f32 %v724_v2 }
 0x2ed   : > { %1839 = vpow2.f32 %v948_v8 }
 0x2ee   : > { %v1830_v10 = vpop.eup %1829  ;;  %1020 = vperm.xlu0 %1806, %v1828_v20  }
 0x2ef   : > { %1689 = vmatmul.msk.f32.vlgmr.msra.gmra.mxu2 %vm345_vm1, %v1830_v10  ;;  %v1000_v58 = vsel %vm345_vm1, %v1830_v10, 0.0  ;;  %v1832_v62 = vpop.eup %1831 }
 0x2f0   : > { %1001 = vadd.xlane.f32.xlu2 %v1000_v58  ;;  %v1834_v1 = vpop.eup %1833  ;;  %v765_v9 = vmul.f32 %v1832_v62, %v761_v3 }
 0x2f1   : > { %v1836_v6 = vpop.eup %1835  ;;  %v767_v51 = vmul.f32 %v1834_v1, %v763_v41 }
 0x2f2   : > { %v1838_v36 = vpop.eup %1837  ;;  %v764_v39 = vmul.f32 %v1836_v6, %v760_v7  ;;  %v1014_v7 = vld [vmem:[#allocation12] sm:$0xff] }
 0x2f3   : > { %v484_v15 = vld [vmem:[#allocation6 + $0x8] sm:$0xff]  ;;  %v1840_v21 = vpop.eup %1839  ;;  %v766_v49 = vmul.f32 %v1838_v36, %v762_v22 }
 0x2f4   : > { %858 = vmatpush.msra.mxu1 %v484_v15  ;;  %v991_v4 = vmul.f32 %v1840_v21, %v987_v50 }
 0x2f5   : > { %1684 = vmatmul.msk.f32.vlgmr.msra.gmra.mxu1 %vm345_vm1, %v1818_v60 }
 0x2f6   : > { %800 = vperm.xlu0 %1806, %v1832_v62   ;;  %1083 = vmatpush.msrb.mxu1 %v484_v15 }
 0x2fb   : > { %810 = vperm.xlu1 %1805, %v1834_v1  }
 0x2fd   : > { %1688 = vmatmul.msk.f32.vlgmr.msrb.gmra.mxu1 %vm345_vm1, %v1824_v27  ;;  %v989_v27 = vld [vmem:[#allocation11 + $0x18] sm:$0xff] }
 0x2fe   : > { %v993_v29 = vmul.f32 %v2416_v34, %v989_v27 }
 0x303   : > { %795 = vperm.xlu1 %1805, %v1836_v6  }
 0x306   : > { %v2442_v48 = vpop.permute.xlu1 %1030 }
 0x308   : > { %805 = vperm.xlu2 %1807, %v1838_v36  }
 0x310   : > { %1025 = vperm.xlu2 %1807, %v1840_v21  }
 0x335   : > { %v996_v37 = vpop.xlane.xlu0 %995 }
 0x336   : > { %v1006_v38 = vadd.f32 %v996_v37, %v990_v25 }
 0x338   : > { %1010 = vst.msk [vmem:[#allocation11] sm:$0xff] %vm438_vm3, %v1006_v38 }
 0x33d   : > { %v773_v40 = vpop.xlane.xlu0 %772  ;;  %v770_v42 = vpop.xlane.xlu2 %769 }
 0x33e   : > { %v781_v45 = vadd.f32 %v773_v40, %v765_v9  ;;  %v780_v14 = vadd.f32 %v770_v42, %v764_v39 }
 0x33f   : > { %v1214_v19 = vld [vmem:[#allocation11] sm:$0xff] }
 0x340   : > { %786 = vst.msk [vmem:[#allocation8 + $0x8] sm:$0xff] %vm438_vm3, %v781_v45  ;;  %1841 = vrcp.f32 %v1214_v19  ;;  %v1229_v60 = vand.u32 2147483648, %v1214_v19  ;;  %v1227_v63 = vand.u32 2147483647, %v1214_v19  ;;  %vm1223_vm5 = vweird.f32 %v1214_v19  ;;  %v988_v45 = vld [vmem:[#allocation11 + $0x10] sm:$0xff] }
 0x341   : > { %785 = vst.msk [vmem:[#allocation8] sm:$0xff] %vm438_vm3, %v780_v14 }
 0x342   : > { %v1230_v16 = vor.u32 1.1754944e-38, %v1229_v60  ;;  %vm1228_vm7 = vcmp.eq.f32.partialorder %v1227_v63, 8.507059e+37  ;;  %v2452_v54 = vpop.f32.mrf.mxu3 }
 0x345   : > { %v776_v46 = vpop.xlane.xlu0 %775  ;;  %v779_v53 = vpop.xlane.xlu2 %778 }
 0x346   : > { %v1842_v47 = vpop.eup %1841  ;;  %v782_v55 = vadd.f32 %v776_v46, %v766_v49  ;;  %v783_v56 = vadd.f32 %v779_v53, %v767_v51  ;;  %v2457_v10 = vpop.f32.mrf.mxu0 }
 0x347   : > { %v1219_v57 = vmul.f32 %v1842_v47, %v1214_v19  ;;  %v2446_v59 = vld [vmem:[#allocation8 + $0x8] sm:$0xff]  ;;  %vm1224_vm4 = vweird.f32 %v1842_v47 }
 0x348   : > { %787 = vst.msk [vmem:[#allocation8 + $0x10] sm:$0xff] %vm438_vm3, %v782_v55  ;;  %1843 = vrcp.f32 %v2446_v59  ;;  %vm1225_vm6 = vmor %vm1223_vm5, %vm1224_vm4  ;;  %v992_v55 = vmul.f32 %v2386_v33, %v988_v45  ;;  %vm1174_vm4 = vweird.f32 %v2446_v59 }
 0x349   : > { %788 = vst.msk [vmem:[#allocation8 + $0x18] sm:$0xff] %vm438_vm3, %v783_v56  ;;  %v1220_v44 = vsub.f32 1.0, %v1219_v57  ;;  %v1180_v56 = vand.u32 2147483648, %v2446_v59 }
 0x34b   : > { %v1221_v61 = vmul.f32 %v1842_v47, %v1220_v44  ;;  %v1178_v44 = vand.u32 2147483647, %v2446_v59  ;;  %v1181_v33 = vor.u32 1.1754944e-38, %v1180_v56 }
 0x34d   : > { %v999_v43 = vpop.xlane.xlu1 %998  ;;  %v1222_v5 = vadd.f32 %v1842_v47, %v1221_v61 }
 0x34e   : > { %v1007_v11 = vadd.f32 %v999_v43, %v991_v4  ;;  %v2450_v28 = vpop.eup %1843  ;;  %v2478_v43 = vld [vmem:[#allocation8] sm:$0xff] }
 0x34f   : > { %v1226_v18 = vsel %vm1225_vm6, %v1842_v47, %v1222_v5  ;;  %v1152_v23 = vld [vmem:[#allocation8 + $0x10] sm:$0xff]  ;;  %v1170_v31 = vmul.f32 %v2450_v28, %v2446_v59  ;;  %vm1175_vm1 = vweird.f32 %v2450_v28  ;;  %v1062_v47 = vpop.f32.mrf.mxu0  ;;  %vm1179_vm6 = vcmp.eq.f32.partialorder %v1178_v44, 8.507059e+37 }
 0x350   : > { %1011 = vst.msk [vmem:[#allocation11 + $0x8] sm:$0xff] %vm438_vm3, %v1007_v11  ;;  %v1231_v52 = vsel %vm1228_vm7, %v1230_v16, %v1226_v18  ;;  %1845 = vrcp.f32 %v1152_v23  ;;  %v1153_v26 = vld [vmem:[#allocation8 + $0x18] sm:$0xff]  ;;  %v1193_v2 = vand.u32 2147483647, %v1152_v23  ;;  %v1195_v6 = vand.u32 2147483648, %v1152_v23  ;;  %vm1176_vm5 = vmor %vm1174_vm4, %vm1175_vm1  ;;  %v791_v59 = vld [vmem:[#allocation9 + $0x10] sm:$0xff] }
 0x351   : > { %1312 = vperm.xlu1 %1805, %v1231_v52   ;;  %1847 = vrcp.f32 %v1153_v26  ;;  %v1171_v0 = vsub.f32 1.0, %v1170_v31  ;;  %v1210_v24 = vand.u32 2147483648, %v1153_v26  ;;  %v1208_v37 = vand.u32 2147483647, %v1153_v26 }
 0x352   : > { %vm1189_vm10 = vweird.f32 %v1152_v23  ;;  %v1196_v9 = vor.u32 1.1754944e-38, %v1195_v6  ;;  %vm1204_vm12 = vweird.f32 %v1153_v26  ;;  %vm1194_vm13 = vcmp.eq.f32.partialorder %v1193_v2, 8.507059e+37 }
 0x353   : > { %v1172_v3 = vmul.f32 %v2450_v28, %v1171_v0  ;;  %v1211_v42 = vor.u32 1.1754944e-38, %v1210_v24  ;;  %vm1209_vm15 = vcmp.eq.f32.partialorder %v1208_v37, 8.507059e+37 }
 0x354   : > { %v1131_v34 = vpop.f32.mrf.mxu3 }
 0x355   : > { %v1005_v30 = vpop.xlane.xlu1 %1004  ;;  %v1173_v46 = vadd.f32 %v2450_v28, %v1172_v3 }
 0x356   : > { %v1846_v32 = vpop.eup %1845  ;;  %v1009_v35 = vadd.f32 %v1005_v30, %v993_v29 }
 0x357   : > { %v1848_v17 = vpop.eup %1847  ;;  %v1185_v20 = vmul.f32 %v1846_v32, %v1152_v23  ;;  %v2460_v1 = vld [vmem:[#allocation11 + $0x8] sm:$0xff]  ;;  %vm1190_vm8 = vweird.f32 %v1846_v32  ;;  %v1177_v61 = vsel %vm1176_vm5, %v2450_v28, %v1173_v46  ;;  %v883_v23 = vpop.f32.mrf.mxu2 }
 0x358   : > { %1013 = vst.msk [vmem:[#allocation11 + $0x18] sm:$0xff] %vm438_vm3, %v1009_v35  ;;  %v1036_v58 = vpop.permute.xlu0 %1035  ;;  %v1200_v12 = vmul.f32 %v1848_v17, %v1153_v26  ;;  %vm1205_vm9 = vweird.f32 %v1848_v17  ;;  %1849 = vrcp.f32 %v2460_v1  ;;  %vm1191_vm11 = vmor %vm1189_vm10, %vm1190_vm8  ;;  %v1182_v11 = vsel %vm1179_vm6, %v1181_v33, %v1177_v61  ;;  %v792_v26 = vld [vmem:[#allocation9 + $0x18] sm:$0xff] }
 0x359   : > { %v1041_v15 = vmul.f32 %v1036_v58, %v1017_v13  ;;  %v1186_v62 = vsub.f32 1.0, %v1185_v20  ;;  %vm1206_vm14 = vmor %vm1204_vm12, %vm1205_vm9  ;;  %v790_v20 = vld [vmem:[#allocation9 + $0x8] sm:$0xff]  ;;  %v1244_v37 = vand.u32 2147483648, %v2460_v1  ;;  %vm1159_vm6 = vweird.f32 %v2478_v43 }
 0x35a   : > { %v1201_v8 = vsub.f32 1.0, %v1200_v12  ;;  %v1163_v33 = vand.u32 2147483647, %v2478_v43 }
 0x35b   : > { %v1137_v36 = vadd.f32 %v1131_v34, %v1041_v15  ;;  %v1187_v21 = vmul.f32 %v1846_v32, %v1186_v62 }
 0x35c   : > { %v1202_v25 = vmul.f32 %v1848_v17, %v1201_v8 }
 0x35d   : > { %1141 = vst.msk [vmem:[#allocation12 + $0x18] sm:$0xff] %vm360_vm2, %v1137_v36  ;;  %v1188_v38 = vadd.f32 %v1846_v32, %v1187_v21 }
 0x35e   : > { %v1203_v39 = vadd.f32 %v1848_v17, %v1202_v25  ;;  %v2467_v53 = vpop.eup %1849 }
 0x35f   : > { %v1192_v40 = vsel %vm1191_vm11, %v1846_v32, %v1188_v38  ;;  %v1217_v14 = vld [vmem:[#allocation11 + $0x18] sm:$0xff]  ;;  %v1234_v63 = vmul.f32 %v2467_v53, %v2460_v1  ;;  %vm1239_vm10 = vweird.f32 %v2467_v53  ;;  %vm1238_vm11 = vweird.f32 %v2460_v1 }
 0x360   : > { %v1021_v19 = vpop.permute.xlu0 %1020  ;;  %v1197_v22 = vsel %vm1194_vm13, %v1196_v9, %v1192_v40  ;;  %v1207_v41 = vsel %vm1206_vm14, %v1848_v17, %v1203_v39  ;;  %1851 = vrcp.f32 %v1217_v14  ;;  %v1274_v52 = vand.u32 2147483648, %v1217_v14  ;;  %v1016_v17 = vld [vmem:[#allocation12 + $0x10] sm:$0xff]  ;;  %vm1240_vm12 = vmor %vm1238_vm11, %vm1239_vm10 }
 0x361   : > { %v1038_v49 = vmul.f32 %v1021_v19, %v1014_v7  ;;  %1294 = vperm.xlu1 %1805, %v1197_v22   ;;  %v1212_v51 = vsel %vm1209_vm15, %v1211_v42, %v1207_v41  ;;  %v1235_v18 = vsub.f32 1.0, %v1234_v63  ;;  %1853 = vrcp.f32 %v2478_v43  ;;  %v789_v7 = vld [vmem:[#allocation9] sm:$0xff] }
 0x362   : > { %1299 = vperm.xlu2 %1807, %v1212_v51   ;;  %v1272_v29 = vand.u32 2147483647, %v1217_v14  ;;  %v1275_v62 = vor.u32 1.1754944e-38, %v1274_v52  ;;  %v1040_v8 = vmul.f32 %v2442_v48, %v1016_v17  ;;  %v1242_v48 = vand.u32 2147483647, %v2460_v1 }
 0x363   : > { %v1134_v57 = vadd.f32 %v1062_v47, %v1038_v49  ;;  %v1002_v50 = vpop.xlane.xlu2 %1001  ;;  %v1236_v35 = vmul.f32 %v2467_v53, %v1235_v18  ;;  %v1245_v22 = vor.u32 1.1754944e-38, %v1244_v37 }
 0x364   : > { %v1008_v60 = vadd.f32 %v1002_v50, %v992_v55  ;;  %vm1273_vm9 = vcmp.eq.f32.partialorder %v1272_v29, 8.507059e+37  ;;  %vm1243_vm13 = vcmp.eq.f32.partialorder %v1242_v48, 8.507059e+37 }
 0x365   : > { %1138 = vst.msk [vmem:[#allocation12] sm:$0xff] %vm360_vm2, %v1134_v57  ;;  %v1237_v21 = vadd.f32 %v2467_v53, %v1236_v35 }
 0x366   : > { %v1852_v4 = vpop.eup %1851  ;;  %1012 = vst.msk [vmem:[#allocation11 + $0x10] sm:$0xff] %vm438_vm3, %v1008_v60  ;;  %vm1268_vm3 = vweird.f32 %v1217_v14 }
 0x367   : > { %v1264_v5 = vmul.f32 %v1852_v4, %v1217_v14  ;;  %vm1269_vm7 = vweird.f32 %v1852_v4  ;;  %v2485_v0 = vpop.eup %1853  ;;  %v1241_v40 = vsel %vm1240_vm12, %v2467_v53, %v1237_v21  ;;  %v1015_v14 = vld [vmem:[#allocation12 + $0x8] sm:$0xff] }
 0x368   : > { %v801_v58 = vpop.permute.xlu0 %800  ;;  %vm1270_vm8 = vmor %vm1268_vm3, %vm1269_vm7  ;;  %v1246_v51 = vsel %vm1243_vm13, %v1245_v22, %v1241_v40  ;;  %vm1160_vm5 = vweird.f32 %v2485_v0  ;;  %vm1164_vm3 = vcmp.eq.f32.partialorder %v1163_v33, 8.507059e+37 }
 0x369   : > { %1289 = vperm.xlu1 %1805, %v1182_v11   ;;  %v1265_v16 = vsub.f32 1.0, %v1264_v5  ;;  %v814_v36 = vmul.f32 %v801_v58, %v790_v20  ;;  %vm1161_vm7 = vmor %vm1159_vm6, %vm1160_vm5 }
 0x36b   : > { %v806_v27 = vpop.permute.xlu2 %805  ;;  %v1266_v28 = vmul.f32 %v1852_v4, %v1265_v16 }
 0x36c   : > { %v815_v30 = vmul.f32 %v806_v27, %v791_v59 }
 0x36d   : > { %v811_v31 = vpop.permute.xlu1 %810  ;;  %v1267_v32 = vadd.f32 %v1852_v4, %v1266_v28  ;;  %v2482_v13 = vld [vmem:[#allocation11 + $0x10] sm:$0xff]  ;;  %v1334_v28 = vstv %s1149_s28 }
 0x36e   : > { %v816_v12 = vmul.f32 %v811_v31, %v792_v26  ;;  %v911_v15 = vadd.f32 %v883_v23, %v815_v30  ;;  %1855 = vrcp.f32 %v2482_v13  ;;  %v1259_v46 = vand.u32 2147483648, %v2482_v13 }
 0x36f   : > { %v1271_v34 = vsel %vm1270_vm8, %v1852_v4, %v1267_v32  ;;  %v1257_v53 = vand.u32 2147483647, %v2482_v13  ;;  %vm1253_vm15 = vweird.f32 %v2482_v13  ;;  %v1165_v4 = vand.u32 2147483648, %v2478_v43  ;;  %v1306_v32 = vld [vmem:[#allocation12] sm:$0xff] }
 0x370   : > { %v912_v2 = vadd.f32 %v2452_v54, %v816_v12  ;;  %916 = vst.msk [vmem:[#allocation9 + $0x10] sm:$0xff] %vm360_vm2, %v911_v15  ;;  %v1276_v6 = vsel %vm1273_vm9, %v1275_v62, %v1271_v34  ;;  %v1155_v54 = vmul.f32 %v2485_v0, %v2478_v43  ;;  %v1309_v62 = vld [vmem:[#allocation12 + $0x18] sm:$0xff] }
 0x371   : > { %1327 = vperm.xlu0 %1806, %v1276_v6   ;;  %vm1258_vm4 = vcmp.eq.f32.partialorder %v1257_v53, 8.507059e+37  ;;  %v1166_v11 = vor.u32 1.1754944e-38, %v1165_v4  ;;  %v1478_v53 = vld [vmem:[#allocation19 + $0x20] sm:$0xff] }
 0x372   : > { %917 = vst.msk [vmem:[#allocation9 + $0x18] sm:$0xff] %vm360_vm2, %v912_v2  ;;  %v860_v24 = vpop.f32.mrf.mxu1  ;;  %v1108_v25 = vpop.f32.mrf.mxu2  ;;  %v1156_v49 = vsub.f32 1.0, %v1155_v54 }
 0x373   : > { %v910_v38 = vadd.f32 %v860_v24, %v814_v36  ;;  %v1136_v3 = vadd.f32 %v1108_v25, %v1040_v8  ;;  %v1026_v19 = vpop.permute.xlu2 %1025 }
 0x374   : > { %v1856_v9 = vpop.eup %1855  ;;  %v1039_v47 = vmul.f32 %v1026_v19, %v1015_v14  ;;  %v1157_v44 = vmul.f32 %v2485_v0, %v1156_v49  ;;  %v2069_v19 = vmov 16.0  }
 0x375   : > { %915 = vst.msk [vmem:[#allocation9 + $0x8] sm:$0xff] %vm360_vm2, %v910_v38  ;;  %v796_v39 = vpop.permute.xlu1 %795  ;;  %v1249_v42 = vmul.f32 %v1856_v9, %v2482_v13  ;;  %vm1254_vm14 = vweird.f32 %v1856_v9  ;;  %1857 = vrcp.f32 %v2069_v19 }
 0x376   : > { %1140 = vst.msk [vmem:[#allocation12 + $0x10] sm:$0xff] %vm360_vm2, %v1136_v3  ;;  %v813_v45 = vmul.f32 %v796_v39, %v789_v7  ;;  %vm1255_vm1 = vmor %vm1253_vm15, %vm1254_vm14  ;;  %v1158_v63 = vadd.f32 %v2485_v0, %v1157_v44 }
 0x377   : > { %v1250_v41 = vsub.f32 1.0, %v1249_v42  ;;  %v1280_v29 = vld [vmem:[#allocation9 + $0x10] sm:$0xff] }
 0x378   : > { %v909_v1 = vadd.f32 %v2457_v10, %v813_v45  ;;  %v1260_v10 = vor.u32 1.1754944e-38, %v1259_v46  ;;  %v1162_v5 = vsel %vm1161_vm7, %v2485_v0, %v1158_v63  ;;  %v1505_v63 = vld [vmem:[#allocation19 + $0x30] sm:$0xff] }
 0x379   : > { %1317 = vperm.xlu0 %1806, %v1246_v51   ;;  %v1251_v55 = vmul.f32 %v1856_v9, %v1250_v41  ;;  %v1167_v59 = vsel %vm1164_vm3, %v1166_v11, %v1162_v5  ;;  %v1281_v6 = vld [vmem:[#allocation9 + $0x18] sm:$0xff] }
 0x37a   : > { %914 = vst.msk [vmem:[#allocation9] sm:$0xff] %vm360_vm2, %v909_v1  ;;  %v1085_v56 = vpop.f32.mrf.mxu1 }
 0x37b   : > { %v1135_v57 = vadd.f32 %v1085_v56, %v1039_v47  ;;  %v1252_v50 = vadd.f32 %v1856_v9, %v1251_v55  ;;  %v1858_v22 = vpop.eup %1857  ;;  %v1479_v47 = vld [vmem:[#allocation19 + $0x28] sm:$0xff] }
 0x37c   : > { %v1360_v41 = vmul.f32 16.0, %v1858_v22  ;;  %vm1364_vm8 = vweird.f32 %v1858_v22  ;;  %1497 = vmatpush.msrb.mxu2 %v1479_v47 }
 0x37d   : > { %1139 = vst.msk [vmem:[#allocation12 + $0x8] sm:$0xff] %vm360_vm2, %v1135_v57  ;;  %v1256_v60 = vsel %vm1255_vm1, %v1856_v9, %v1252_v50  ;;  %v1308_v26 = vld [vmem:[#allocation12 + $0x10] sm:$0xff]  ;;  %v1279_v9 = vld [vmem:[#allocation9 + $0x8] sm:$0xff]  ;;  %v1427_v50 = vld [vmem:[#allocation19 + $0x8] sm:$0xff] }
 0x37e   : > { %v1261_v61 = vsel %vm1258_vm4, %v1260_v10, %v1256_v60  ;;  %v1361_v49 = vsub.f32 1.0, %v1360_v41  ;;  %1498 = vmatpush.msrb.mxu2 %v1478_v53  ;;  %1471 = vmatpush.msra.mxu1 %v1427_v50  ;;  %v1426_v10 = vld [vmem:[#allocation19] sm:$0xff]  ;;  %v1506_v60 = vld [vmem:[#allocation19 + $0x38] sm:$0xff] }
 0x37f   : > { %1322 = vperm.xlu2 %1807, %v1261_v61   ;;  %1524 = vmatpush.msrb.mxu3 %v1506_v60 }
 0x380   : > { %v1362_v1 = vmul.f32 %v1858_v22, %v1361_v49  ;;  %1472 = vmatpush.msra.mxu1 %v1426_v10 }
 0x381   : > { %v1278_v17 = vld [vmem:[#allocation9] sm:$0xff]  ;;  %1525 = vmatpush.msrb.mxu3 %v1505_v63 }
 0x382   : > { %v1363_v51 = vadd.f32 %v1858_v22, %v1362_v1 }
 0x384   : > { %v1307_v3 = vld [vmem:[#allocation12 + $0x8] sm:$0xff]  ;;  %v1365_v46 = vsel %vm1364_vm8, %v1858_v22, %v1363_v51 }
 0x387   : > { %1284 = vperm.xlu2 %1807, %v1167_v59   ;;  %v1430_v59 = vld [vmem:[#allocation19 + $0x18] sm:$0xff] }
 0x388   : > { %1448 = vmatpush.msra.mxu0 %v1430_v59 }
 0x3bc   : > { %v1300_v16 = vpop.permute.xlu2 %1299 }
 0x3bd   : > { %v1305_v8 = vmul.f32 %v1300_v16, %v1281_v6  ;;  %v1429_v16 = vld [vmem:[#allocation19 + $0x10] sm:$0xff] }
 0x3be   : > { %1449 = vmatpush.msra.mxu0 %v1429_v16 }
 0x3c3   : > { %v1313_v18 = vpop.permute.xlu1 %1312 }
 0x3c4   : > { %v1330_v43 = vmul.f32 %v1313_v18, %v1306_v32 }
 0x3c6   : > { %v1335_v58 = vmul.f32 %v1334_v28, %v1330_v43 }
 0x3d3   : > { %v1295_v23 = vpop.permute.xlu1 %1294 }
 0x3d4   : > { %v1304_v30 = vmul.f32 %v1295_v23, %v1280_v29 }
 0x3d9   : > { %v1323_v52 = vpop.permute.xlu2 %1322 }
 0x3da   : > { %v1332_v27 = vmul.f32 %v1323_v52, %v1308_v26 }
 0x3db   : > { %v1290_v54 = vpop.permute.xlu1 %1289 }
 0x3dc   : > { %v1337_v31 = vmul.f32 %v1334_v28, %v1332_v27  ;;  %v1303_v39 = vmul.f32 %v1290_v54, %v1279_v9 }
 0x3de   : > { %v2515_v35 = vsub.f32 %v1304_v30, %v1337_v31 }
 0x3e0   : > { %v1345_v13 = vmul.f32 %v2515_v35, %v2515_v35 }
 0x3e1   : > { %v1285_v20 = vpop.permute.xlu2 %1284 }
 0x3e2   : > { %v1302_v12 = vmul.f32 %v1285_v20, %v1278_v17  ;;  %v1353_v15 = vsel %vm360_vm2, %v1345_v13, 0.0  ;;  %v1808_v17 = vld [vmem:[%s2591_s4] ss:$0 sm:$0xff] }
 0x3e3   : > { %v1328_v0 = vpop.permute.xlu0 %1327  ;;  %1354 = vadd.xlane.f32.xlu0 %v1353_v15 }
 0x3e4   : > { %v1333_v34 = vmul.f32 %v1328_v0, %v1309_v62  ;;  %v2520_v2 = vsub.f32 %v1302_v12, %v1335_v58 }
 0x3e6   : > { %v1338_v36 = vmul.f32 %v1334_v28, %v1333_v34  ;;  %v1343_v21 = vmul.f32 %v2520_v2, %v2520_v2 }
 0x3e8   : > { %v1347_v24 = vsel %vm360_vm2, %v1343_v21, 0.0  ;;  %v2525_v25 = vsub.f32 %v1305_v8, %v1338_v36 }
 0x3e9   : > { %1348 = vadd.xlane.f32.xlu1 %v1347_v24 }
 0x3ea   : > { %v1346_v37 = vmul.f32 %v2525_v25, %v2525_v25 }
 0x3eb   : > { %v1318_v38 = vpop.permute.xlu0 %1317 }
 0x3ec   : > { %v1331_v7 = vmul.f32 %v1318_v38, %v1307_v3  ;;  %v1356_v48 = vsel %vm360_vm2, %v1346_v37, 0.0 }
 0x3ed   : > { %1357 = vadd.xlane.f32.xlu2 %v1356_v48 }
 0x3ee   : > { %v1336_v40 = vmul.f32 %v1334_v28, %v1331_v7 }
 0x3f0   : > { %v2530_v42 = vsub.f32 %v1303_v39, %v1336_v40 }
 0x3f2   : > { %v1344_v45 = vmul.f32 %v2530_v42, %v2530_v42 }
 0x3f4   : > { %v1350_v14 = vsel %vm360_vm2, %v1344_v45, 0.0 }
 0x3f5   : > { %1351 = vadd.xlane.f32.xlu0 %v1350_v14 }
 0x456   : > { %v1355_v55 = vpop.xlane.xlu0 %1354 }
 0x457   : > { %v1368_v56 = vmul.f32 %v1365_v46, %v1355_v55 }
 0x459   : > { %v1372_v57 = vadd.f32 1e-06, %v1368_v56 }
 0x45b   : > { %1859 = vrsqrt.f32 %v1372_v57  ;;  %vm1400_vm10 = vweird.f32 %v1372_v57 }
 0x45c   : > { %v1349_v44 = vpop.xlane.xlu1 %1348 }
 0x45d   : > { %v1366_v61 = vmul.f32 %v1365_v46, %v1349_v44 }
 0x45f   : > { %v1370_v4 = vadd.f32 1e-06, %v1366_v61 }
 0x460   : > { %v1358_v33 = vpop.xlane.xlu2 %1357 }
 0x461   : > { %v1860_v5 = vpop.eup %1859  ;;  %1861 = vrsqrt.f32 %v1370_v4  ;;  %v1369_v11 = vmul.f32 %v1365_v46, %v1358_v33  ;;  %vm1380_vm13 = vweird.f32 %v1370_v4 }
 0x462   : > { %v1395_v18 = vmul.f32 %v1860_v5, %v1372_v57  ;;  %vm1401_vm9 = vweird.f32 %v1860_v5 }
 0x463   : > { %v1373_v23 = vadd.f32 1e-06, %v1369_v11  ;;  %vm1402_vm11 = vmor %vm1400_vm10, %vm1401_vm9 }
 0x464   : > { %v1396_v52 = vmul.f32 %v1860_v5, %v1395_v18 }
 0x465   : > { %1863 = vrsqrt.f32 %v1373_v23  ;;  %vm1410_vm1 = vweird.f32 %v1373_v23 }
 0x466   : > { %v1397_v26 = vmul.f32 0.5, %v1396_v52 }
 0x467   : > { %v1862_v27 = vpop.eup %1861 }
 0x468   : > { %v1398_v28 = vsub.f32 1.5, %v1397_v26  ;;  %v1375_v29 = vmul.f32 %v1862_v27, %v1370_v4  ;;  %v1352_v30 = vpop.xlane.xlu0 %1351  ;;  %vm1381_vm12 = vweird.f32 %v1862_v27 }
 0x469   : > { %v1367_v31 = vmul.f32 %v1365_v46, %v1352_v30  ;;  %vm1382_vm14 = vmor %vm1380_vm13, %vm1381_vm12 }
 0x46a   : > { %v1399_v32 = vmul.f32 %v1860_v5, %v1398_v28  ;;  %v1376_v43 = vmul.f32 %v1862_v27, %v1375_v29 }
 0x46b   : > { %v1864_v13 = vpop.eup %1863  ;;  %v1371_v20 = vadd.f32 1e-06, %v1367_v31 }
 0x46c   : > { %v1403_v58 = vsel %vm1402_vm11, %v1860_v5, %v1399_v32  ;;  %v1377_v12 = vmul.f32 0.5, %v1376_v43  ;;  %v1405_v15 = vmul.f32 %v1864_v13, %v1373_v23  ;;  %vm1411_vm15 = vweird.f32 %v1864_v13 }
 0x46d   : > { %v1416_v62 = vmul.f32 %v1403_v58, %v2515_v35  ;;  %1865 = vrsqrt.f32 %v1371_v20  ;;  %vm1412_vm4 = vmor %vm1410_vm1, %vm1411_vm15  ;;  %vm1390_vm6 = vweird.f32 %v1371_v20 }
 0x46e   : > { %v1378_v0 = vsub.f32 1.5, %v1377_v12  ;;  %v1406_v34 = vmul.f32 %v1864_v13, %v1405_v15 }
 0x46f   : > { %v1424_v6 = vmul.f32 %v1808_v17, %v1416_v62 }
 0x470   : > { %v1379_v8 = vmul.f32 %v1862_v27, %v1378_v0  ;;  %v1407_v36 = vmul.f32 0.5, %v1406_v34 }
 0x471   : > { %1693 = vmatmul.msk.f32.vlgmr.msrb.gmra.mxu2 %vm360_vm2, %v1424_v6 }
 0x472   : > { %v1383_v21 = vsel %vm1382_vm14, %v1862_v27, %v1379_v8  ;;  %v1408_v24 = vsub.f32 1.5, %v1407_v36 }
 0x473   : > { %v1866_v37 = vpop.eup %1865  ;;  %v1414_v54 = vmul.f32 %v1383_v21, %v2520_v2 }
 0x474   : > { %v1409_v38 = vmul.f32 %v1864_v13, %v1408_v24  ;;  %v1385_v35 = vmul.f32 %v1866_v37, %v1371_v20  ;;  %vm1391_vm5 = vweird.f32 %v1866_v37 }
 0x475   : > { %v1422_v3 = vmul.f32 %v1808_v17, %v1414_v54  ;;  %vm1392_vm7 = vmor %vm1390_vm6, %vm1391_vm5 }
 0x476   : > { %v1413_v7 = vsel %vm1412_vm4, %v1864_v13, %v1409_v38  ;;  %v1386_v48 = vmul.f32 %v1866_v37, %v1385_v35 }
 0x477   : > { %v1417_v9 = vmul.f32 %v1413_v7, %v2525_v25  ;;  %1692 = vmatmul.msk.f32.vlgmr.msra.gmra.mxu1 %vm360_vm2, %v1422_v3 }
 0x478   : > { %v1387_v39 = vmul.f32 0.5, %v1386_v48 }
 0x479   : > { %v1425_v40 = vmul.f32 %v1808_v17, %v1417_v9 }
 0x47a   : > { %v1388_v45 = vsub.f32 1.5, %v1387_v39 }
 0x47b   : > { %1694 = vmatmul.msk.f32.vlgmr.msrb.gmra.mxu3 %vm360_vm2, %v1425_v40 }
 0x47c   : > { %v1389_v2 = vmul.f32 %v1866_v37, %v1388_v45 }
 0x47e   : > { %v1393_v14 = vsel %vm1392_vm7, %v1866_v37, %v1389_v2 }
 0x47f   : > { %v1415_v19 = vmul.f32 %v1393_v14, %v2530_v42 }
 0x481   : > { %v1423_v22 = vmul.f32 %v1808_v17, %v1415_v19 }
 0x483   : > { %1691 = vmatmul.msk.f32.vlgmr.msra.gmra.mxu0 %vm360_vm2, %v1423_v22 }
 0x4f4   : > { %v1474_v25 = vpop.f32.mrf.mxu1  ;;  %v1500_v1 = vpop.f32.mrf.mxu2 }
 0x4fe   : > { %v1527_v42 = vpop.f32.mrf.mxu3 }
 0x500   : > { %v1451_v41 = vpop.f32.mrf.mxu0 }
 0x501   : > { %v1475_v49 = vadd.f32 %v1474_v25, %v1451_v41 }
 0x503   : > { %v1503_v51 = vadd.f32 %v1500_v1, %v1475_v49 }
 0x505   : > { %v1530_v46 = vadd.f32 %v1527_v42, %v1503_v51 }
 0x507   : > { %1532 = vst.msk [vmem:[%s287_s13] sm:$0xff] %vm301_vm0, %v1530_v46 }
 0x508   : > { %1984 = shalt.err (!%p1981_p13)
}
 0x509   : > { %1709 = dma.vmem_to_hbm [thread:$0]  (%p2177_p0), %s1547_s14, 128, %s1549_s15, %s1534_s23  }
 0x50a PF: > { %s1560_s18 = sand.u32 1, %s2023_s20   ;;  %p1723_p2 = pnand %p1657_p6, %p2184_p5 }
 0x50b   : > { %s1561_s8 = scalar_lea.sflag [#allocation16], %s1560_s18 }
 0x50c   : > { %p1724_p4 = pneg %p1723_p2 }
 0x50e   : > { %2018 = dma.done.wait (%p1724_p4), %s1561_s8, 128  }
 0x50f   : > { %2020 = vsyncadd (%p1724_p4), %s1561_s8, 4294967168  ;;  %s23_s25 = sadd.s32 1, %s2043_s25   ;;  %s2598_s20 = smov %s2027_s21 }
 0x510   : > { %p20_p7 = scmp.ge.s32.totalorder %s23_s25, 4   ;;  %s2599_s21 = smov %s2031_s22 }
 0x511   : > { %s2600_s22 = smov %s2182_s6  ;;  %s2601_s23 = smov %s2039_s24 }
 0x512   : > { %s2602_s24 = smov %s2604_s17  ;;  %22 = sbr.rel (!%p20_p7) target bundleno = 9 (0x9), region = 122 }
 0x517   :  { %1567 = vsyncpa [#allocation15], 1 }
 0x518   :  { %1569 = vsyncpa [#allocation15 + $0x1], 1 }
 0x519   :  { %1570 = vsyncpa [#allocation18], 1 }
 0x51a   :  { %1571 = vsyncpa [#allocation16], 1 }
 0x51b   :  { %1573 = vsyncpa [#allocation16 + $0x1], 1 }

</bundles_post_ra>
